<compile_context>
chip_gen: v7x
topology: tpu7x:2x2x1
jax: 0.10.0
libtpu: 0.0.40
codegen_flags: <defaults>
</compile_context>

<pallas_src>
import functools
import math

import jax
import jax.numpy as jnp
from jax.experimental import pallas as pl
from jax.experimental.pallas import tpu as pltpu


# -----------------------------------------------------------------------------
# Generation-aware VMEM budget
# -----------------------------------------------------------------------------

_DEFAULT_PHYS_VMEM = 128 * 1024 * 1024
_vmem_cache = [None]


def _vmem_limit_bytes():
    """~half of physical VMEM: ~64 MiB on v5e/v6e (128 MiB), ~32 MiB on v7x (64 MiB)."""
    if _vmem_cache[0] is None:
        try:
            phys = int(getattr(pltpu.get_tpu_info(), "vmem_capacity_bytes",
                               _DEFAULT_PHYS_VMEM))
        except Exception:
            phys = _DEFAULT_PHYS_VMEM
        _vmem_cache[0] = int(max(32 << 20, min(phys // 2, 96 << 20)))
    return _vmem_cache[0]


def _gelu_f32(x):
    # tanh-approx GELU in f32 (VPU/EUP friendly on every generation).
    # TODO(synk): PyTorch nn.GELU / timm ConvNeXt default to the exact erf form;
    # the tanh approximation differs at the ~1e-3 level.
    return 0.5 * x * (1.0 + jnp.tanh(0.7978845608028654 *
                                     (x + 0.044715 * x * x * x)))


# -----------------------------------------------------------------------------
# Tile selection
# -----------------------------------------------------------------------------

def _pick_spatial_tile(HpWp, K, D, budget):
    """Largest multiple-of-16 divisor of HpWp (bf16 sublane packing) that keeps
    the per-step working set inside `budget`; falls back to the full extent."""
    def step_bytes(t):
        return 2 * t * K * 2 + t * D * 4        # rows double-buffered + f32 intermediate
    tile_s = HpWp
    cands = [t for t in range(16, HpWp + 1, 16) if HpWp % t == 0]
    if cands:
        fitting = [t for t in cands if step_bytes(t) <= budget]
        tile_s = max(fitting) if fitting else min(cands)   # budget-guarded fallback
    return tile_s


def _pick_image_block(NB, tile_s, K, D, budget, target_m=256):
    """Images per grid step: grow the matmul M toward >=256 rows (v6e/v7x MXU
    height) within the VMEM budget, keeping >=2 image blocks when NB >= 2 so
    both v7x TensorCores get work (no-op on single-TC v5e/v6e)."""
    def step_bytes(n):
        return 2 * n * tile_s * K * 2 + n * tile_s * D * 4
    n_blk = 1
    for cand in range(1, NB + 1):
        if NB % cand:
            continue
        if NB >= 2 and NB // cand < 2:
            break
        if step_bytes(cand) > budget:
            break
        n_blk = cand
        if cand * tile_s >= target_m:
            break
    return n_blk


# -----------------------------------------------------------------------------
# Fused backbone kernel: patch-embed matmul + GELU + global-avg-pool + LayerNorm
# -----------------------------------------------------------------------------

def _fused_backbone_kernel(x_ref, w_ref, b_ref, g_ref, bt_ref, o_ref, acc_ref,
                           *, inv_hw, eps):
    """grid = (image block n [parallel], spatial tile s [arbitrary/reduction]).

    x_ref : [n_blk, tile_s, K] bf16 im2col rows (K unpadded)
    w_ref : [K, D]             bf16 patch-embed weight
    b/g/bt: [1, D]             f32 bias / LN gamma / LN beta
    o_ref : [n_blk, D]         f32 pooled + layer-normed features
    acc   : [n_blk, D]         f32 spatial-sum accumulator (VMEM scratch)
    """
    s = pl.program_id(1)

    @pl.when(s == 0)
    def _init():
        acc_ref[...] = jnp.zeros_like(acc_ref)

    n_blk, tile_s, K = x_ref.shape
    # Tall MXU matmul: all images of the block stacked along M (>=256 rows).
    x = x_ref[...].reshape(n_blk * tile_s, K)
    h = jnp.dot(x, w_ref[...], preferred_element_type=jnp.float32)
    h = _gelu_f32(h + b_ref[...])
    # Per-image spatial partial sum (sublane reduce; XLU has slack here).
    acc_ref[...] += jnp.sum(h.reshape(n_blk, tile_s, -1), axis=1)

    @pl.when(s == pl.num_programs(1) - 1)
    def _epilogue():
        pooled = acc_ref[...] * inv_hw                       # [n_blk, D] mean pool
        mu = jnp.mean(pooled, axis=-1, keepdims=True)
        var = jnp.mean((pooled - mu) ** 2, axis=-1, keepdims=True)
        normed = (pooled - mu) * jax.lax.rsqrt(var + eps)
        o_ref[...] = (normed * g_ref[...] + bt_ref[...]).astype(o_ref.dtype)


def fused_backbone_pool_ln(rows, w, b, gamma, beta):
    """rows: [NB, HpWp, K] bf16 -> pooled+normalized features [NB, D] f32."""
    NB, HpWp, K = rows.shape
    D = w.shape[1]
    vmem_limit = _vmem_limit_bytes()
    budget = max(vmem_limit // 3, 2 << 20)
    tile_s = _pick_spatial_tile(HpWp, K, D, budget)
    n_blk = _pick_image_block(NB, tile_s, K, D, budget)
    img_blocks, s_tiles = NB // n_blk, HpWp // tile_s

    kernel = functools.partial(_fused_backbone_kernel,
                               inv_hw=1.0 / float(HpWp), eps=1e-6)
    out = pl.pallas_call(
        kernel,
        out_shape=jax.ShapeDtypeStruct((img_blocks, n_blk, D), jnp.float32),
        grid_spec=pltpu.PrefetchScalarGridSpec(
            num_scalar_prefetch=0,
            grid=(img_blocks, s_tiles),
            in_specs=[
                pl.BlockSpec((n_blk, tile_s, K), lambda n, s: (n, s, 0)),
                pl.BlockSpec((K, D), lambda n, s: (0, 0)),
                pl.BlockSpec((1, D), lambda n, s: (0, 0)),
                pl.BlockSpec((1, D), lambda n, s: (0, 0)),
                pl.BlockSpec((1, D), lambda n, s: (0, 0)),
            ],
            out_specs=pl.BlockSpec((None, n_blk, D), lambda n, s: (n, 0, 0)),
            scratch_shapes=[pltpu.VMEM((n_blk, D), jnp.float32)],
        ),
        compiler_params=pltpu.CompilerParams(
            dimension_semantics=("parallel", "arbitrary"),
            vmem_limit_bytes=vmem_limit),
    )(rows, w, b, gamma, beta)
    return out.reshape(NB, D)


# -----------------------------------------------------------------------------
# Fused feature-map branch: patch-embed + GELU + LPN ring pooling + reducer
# -----------------------------------------------------------------------------

def _fused_lpn_reducer_kernel(x_ref, w_ref, b_ref, rw_ref, rb_ref, o_ref,
                              *, Hp, Wp, num_parts):
    """One grid step = one image block. The feature map lives only in VMEM/vregs.

    x_ref : [n_blk, Hp*Wp, K] bf16 im2col rows
    w_ref : [K, D]            bf16 patch-embed weight
    b_ref : [1, D]            f32 patch-embed bias
    rw_ref: [num_parts*D, R]  f32 reducer weight
    rb_ref: [1, R]            f32 reducer bias
    o_ref : [n_blk, R]        f32 reduced LPN features
    """
    n_blk, HW, K = x_ref.shape
    D = w_ref.shape[1]
    x = x_ref[...].reshape(n_blk * HW, K)
    h = jnp.dot(x, w_ref[...], preferred_element_type=jnp.float32)
    h = _gelu_f32(h + b_ref[...])
    fmap = h.reshape(n_blk, Hp, Wp, D)                          # NHWC, f32

    c_h, c_w = Hp // 2, Wp // 2
    per_h, per_w = Hp // (2 * num_parts), Wp // (2 * num_parts)

    def window_sum(h0, h1, w0, w1):
        # fused 2-axis reduce, f32 accumulate, no whole-array copies
        return jnp.sum(fmap[:, h0:h1, w0:w1, :], axis=(1, 2))   # [n_blk, D]

    # Reference semantics (avg pool, no_overlap=True): part_i is the ring
    # (window_i minus window_{i-1}) summed and divided by the FULL window_i
    # area (the reference zero-fills the interior then AdaptiveAvgPool2d's the
    # whole window).  Assumes a square-ish map (per_h == per_w), matching the
    # reference's F.pad argument ordering.
    parts = []
    prev_sum = None
    for i in range(1, num_parts + 1):
        if i < num_parts:
            h0, h1 = c_h - i * per_h, c_h + i * per_h
            w0, w1 = c_w - i * per_w, c_w + i * per_w
        else:
            h0, h1, w0, w1 = 0, Hp, 0, Wp
        cur = window_sum(h0, h1, w0, w1)
        ring = cur if prev_sum is None else cur - prev_sum
        area = (h1 - h0) * (w1 - w0)
        parts.append(ring * (1.0 / float(area)))
        prev_sum = cur
    feats = jnp.concatenate(parts, axis=-1)                     # [n_blk, num_parts*D]
    # Reducer Linear in f32 (tiny K; avoids the bf16 rounding of a cast path).
    red = jnp.dot(feats, rw_ref[...], preferred_element_type=jnp.float32)
    o_ref[...] = (red + rb_ref[...]).astype(o_ref.dtype)


def fused_lpn_reducer(rows, w, b, rw, rb, Hp, Wp, num_parts=4):
    """rows: [NB, Hp*Wp, K] bf16 -> reduced LPN features [NB, R] f32 (one call)."""
    NB, HpWp, K = rows.shape
    D = w.shape[1]
    R = rw.shape[1]
    assert HpWp == Hp * Wp
    if Hp // (2 * num_parts) < 1 and Wp // (2 * num_parts) < 1:
        # TODO(synk): bilinear interpolation (align_corners=True) branch of the
        # reference is not implemented; use feature maps with H, W >= 2*num_parts.
        raise NotImplementedError("feature map too small for LPN without interpolation")
    vmem_limit = _vmem_limit_bytes()
    budget = max(vmem_limit // 3, 2 << 20)
    if 2 * HpWp * K * 2 + 2 * HpWp * D * 4 > budget:
        # TODO(synk): spatial/channel-blocked LPN path for feature maps too
        # large to hold one full image in VMEM (not needed at these sizes).
        raise NotImplementedError("feature map too large for the fused LPN kernel")
    n_blk = _pick_image_block(NB, HpWp, K, D, budget)
    img_blocks = NB // n_blk

    kernel = functools.partial(_fused_lpn_reducer_kernel, Hp=Hp, Wp=Wp,
                               num_parts=num_parts)
    out = pl.pallas_call(
        kernel,
        out_shape=jax.ShapeDtypeStruct((img_blocks, n_blk, R), jnp.float32),
        grid_spec=pltpu.PrefetchScalarGridSpec(
            num_scalar_prefetch=0,
            grid=(img_blocks,),
            in_specs=[
                pl.BlockSpec((n_blk, HpWp, K), lambda n: (n, 0, 0)),
                pl.BlockSpec((K, D), lambda n: (0, 0)),
                pl.BlockSpec((1, D), lambda n: (0, 0)),
                pl.BlockSpec((num_parts * D, R), lambda n: (0, 0)),
                pl.BlockSpec((1, R), lambda n: (0, 0)),
            ],
            out_specs=pl.BlockSpec((None, n_blk, R), lambda n: (n, 0, 0)),
        ),
        compiler_params=pltpu.CompilerParams(
            dimension_semantics=("parallel",),
            vmem_limit_bytes=vmem_limit),
    )(rows, w, b, rw, rb)
    return out.reshape(NB, R)


# -----------------------------------------------------------------------------
# Model wrapper (parameter setup + glue in plain JAX)
# -----------------------------------------------------------------------------

class GeomatchPallas:
    """Stand-in for TimmModel_Geomatch_5 with Pallas hot paths."""

    def __init__(self, key, in_chans=3, patch=4, embed_dim=128,
                 reduced_dim=128, num_parts=4):
        # embed_dim / reduced_dim kept lane-dense (multiples of 128).
        assert embed_dim % 128 == 0 and reduced_dim % 128 == 0
        self.patch = patch
        self.embed_dim = embed_dim
        self.reduced_dim = reduced_dim
        self.num_parts = num_parts
        self.kdim = patch * patch * in_chans          # 48: kept UNPADDED in HBM

        k0, k1, k2 = jax.random.split(key, 3)
        # TODO(synk): real ConvNeXt-large weights cannot be loaded; deterministic
        # random stand-in parameters of the analogous structure are used instead.
        w = jax.random.normal(k0, (self.kdim, embed_dim), jnp.float32) / math.sqrt(self.kdim)
        self.patch_w = w.astype(jnp.bfloat16)
        self.patch_b = jnp.zeros((1, embed_dim), jnp.float32)
        self.ln_gamma = jnp.ones((1, embed_dim), jnp.float32)
        self.ln_beta = jnp.zeros((1, embed_dim), jnp.float32)
        # reducer: nn.Linear(num_parts * embed_dim, reduced_dim), kept in f32.
        rin = num_parts * embed_dim
        self.reducer_w = jax.random.normal(k1, (rin, reduced_dim), jnp.float32) / math.sqrt(rin)
        self.reducer_b = (jax.random.normal(k2, (reduced_dim,), jnp.float32) * 0.01
                          ).reshape(1, reduced_dim)
        self.logit_scale = jnp.asarray(math.log(1 / 0.07), jnp.float32)  # unused in fwd

    # -- backbone stand-in ----------------------------------------------------
    def _patchify(self, imgs_nchw):
        """NCHW f32 -> [NB, Hp*Wp, K] bf16 im2col rows, K = p*p*C (unpadded)."""
        B, C, H, W = imgs_nchw.shape
        p = self.patch
        x = imgs_nchw.astype(jnp.bfloat16)            # cast first: halves XLA bytes
        x = x.reshape(B, C, H // p, p, W // p, p)
        x = jnp.transpose(x, (0, 2, 4, 3, 5, 1))      # B, Hp, Wp, ph, pw, C
        rows = x.reshape(B, (H // p) * (W // p), p * p * C)
        # TODO(synk): fold this transpose/reshape into the Pallas kernel via a
        # BlockSpec over the raw image to remove the XLA-side im2col intermediate.
        return rows, H // p, W // p

    def model(self, imgs_nchw):
        """`self.model(img)` equivalent, fully fused: [NB,C,H,W] -> [NB,D]."""
        rows, _, _ = self._patchify(imgs_nchw)
        return fused_backbone_pool_ln(rows, self.patch_w, self.patch_b,
                                      self.ln_gamma, self.ln_beta)

    def lpn_reduced_features(self, imgs_nchw):
        """forward_features -> get_lpn_features -> reducer, one fused kernel."""
        rows, Hp, Wp = self._patchify(imgs_nchw)
        return fused_lpn_reducer(rows, self.patch_w, self.patch_b,
                                 self.reducer_w, self.reducer_b,
                                 Hp, Wp, self.num_parts)

    # -- forward (mirrors the PyTorch control flow) ---------------------------
    def forward(self, imgq1, imgq2=None, imgr1=None, imgr2=None, imgq3=None,
                return_feature_map=False):
        random_fov = False
        if imgq2 is not None:
            if not random_fov:
                B = imgq1.shape[0]
                if return_feature_map:
                    # Four forward_features+LPN+reducer passes fused into ONE call.
                    imgs = jnp.concatenate([imgq1, imgq2, imgr1, imgr2], axis=0)
                    red = self.lpn_reduced_features(imgs)
                    return tuple(red[i * B:(i + 1) * B] for i in range(4))
                # Batch all 5 backbone passes into ONE fused pallas_call.
                imgs = jnp.concatenate([imgq1, imgq2, imgq3, imgr1, imgr2], axis=0)
                feats = self.model(imgs)                          # [5B, D]
                fq1, fq2, fq3, fr1, fr2 = (feats[i * B:(i + 1) * B] for i in range(5))
                return (fq1, fq2, fr1, fr2, fq3)
            # TODO(synk): random_fov branch (host-side python random crop width)
            # omitted; it is not kernel compute.
            return None
        return self.model(imgq1)


# -----------------------------------------------------------------------------
# Main
# -----------------------------------------------------------------------------

if __name__ == "__main__":
    key = jax.random.PRNGKey(0)
    kparam, kq1, kq2, kq3, kr1, kr2 = jax.random.split(key, 6)

    # Small shapes consistent with the module: NCHW images, 3 channels,
    # 32x32 spatial -> 8x8 feature map (so LPN needs no interpolation).
    B, C, H, W = 2, 3, 32, 32
    imgq1 = jax.random.normal(kq1, (B, C, H, W), jnp.float32)
    imgq2 = jax.random.normal(kq2, (B, C, H, W), jnp.float32)
    imgq3 = jax.random.normal(kq3, (B, C, H, W), jnp.float32)
    imgr1 = jax.random.normal(kr1, (B, C, H, W), jnp.float32)
    imgr2 = jax.random.normal(kr2, (B, C, H, W), jnp.float32)

    model = GeomatchPallas(kparam, in_chans=C, patch=4, embed_dim=128,
                           reduced_dim=128, num_parts=4)

    # Main forward path (return_feature_map=False): 5 feature vectors from one
    # fused pallas_call; grid = 2 "parallel" image blocks of 5 images each
    # (M = 320 rows per MXU matmul, both v7x TensorCores busy).
    fwd = jax.jit(lambda a, b, c, d, e: model.forward(a, b, c, d, e))
    fq1, fq2, fr1, fr2, fq3 = jax.block_until_ready(
        fwd(imgq1, imgq2, imgr1, imgr2, imgq3))
    for o in (fq1, fq2, fr1, fr2, fq3):
        assert o.shape == (B, model.embed_dim), o.shape
        assert bool(jnp.all(jnp.isfinite(o)))

    # return_feature_map branch of the reference (forward_features -> LPN ->
    # reducer), fully fused into a single pallas_call.
    fm_fwd = jax.jit(lambda a, b, c, d: model.forward(a, b, c, d, None,
                                                      return_feature_map=True))
    rq1, rq2, rr1, rr2 = jax.block_until_ready(fm_fwd(imgq1, imgq2, imgr1, imgr2))
    for o in (rq1, rq2, rr1, rr2):
        assert o.shape == (B, model.reduced_dim), o.shape
        assert bool(jnp.all(jnp.isfinite(o)))

    print("KERNEL_OK")
</pallas_src>

<mosaic_0001>
module attributes {stable_mosaic.version = 11 : i64} {
  func.func @_fused_backbone_kernel(%arg0: i32, %arg1: i32, %arg2: memref<5x64x48xbf16, #tpu.memory_space<vmem>>, %arg3: memref<48x128xbf16, #tpu.memory_space<vmem>>, %arg4: memref<1x128xf32, #tpu.memory_space<vmem>>, %arg5: memref<1x128xf32, #tpu.memory_space<vmem>>, %arg6: memref<1x128xf32, #tpu.memory_space<vmem>>, %arg7: memref<1x5x128xf32, #tpu.memory_space<vmem>>, %arg8: memref<5x128xf32, #tpu.memory_space<vmem>>) attributes {dimension_semantics = [#tpu.dimension_semantics<parallel>, #tpu.dimension_semantics<arbitrary>], iteration_bounds = array<i64: 2, 1>, scalar_prefetch = 0 : i64, scratch_operands = 1 : i64, tpu.core_type = #tpu.core_type<tc>, window_params = [{transform_indices = @transform_0, window_bounds = array<i64: 5, 64, 48>}, {pipeline_mode = #tpu.pipeline_mode<synchronous>, transform_indices = @transform_1, window_bounds = array<i64: 48, 128>}, {pipeline_mode = #tpu.pipeline_mode<synchronous>, transform_indices = @transform_2, window_bounds = array<i64: 1, 128>}, {pipeline_mode = #tpu.pipeline_mode<synchronous>, transform_indices = @transform_3, window_bounds = array<i64: 1, 128>}, {pipeline_mode = #tpu.pipeline_mode<synchronous>, transform_indices = @transform_4, window_bounds = array<i64: 1, 128>}, {transform_indices = @transform_5, window_bounds = array<i64: 1, 5, 128>}]} {
    %c0_i32 = arith.constant 0 : i32
    %0 = arith.cmpi eq, %arg1, %c0_i32 : i32
    %1 = arith.extui %0 : i1 to i32
    %c0_i32_0 = arith.constant 0 : i32
    %2 = arith.cmpi ne, %1, %c0_i32_0 : i32
    scf.if %2 {
      %cst_18 = arith.constant 0.000000e+00 : f32
      %31 = vector.broadcast %cst_18 : f32 to vector<5x128xf32>
      %c0_19 = arith.constant 0 : index
      %c0_20 = arith.constant 0 : index
      %32 = vector.load %arg8[%c0_19, %c0_20] : memref<5x128xf32, #tpu.memory_space<vmem>>, vector<5x128xf32>
      tpu.vector_store %arg8[%c0_19, %c0_20], %31 {strides = array<i32>} : memref<5x128xf32, #tpu.memory_space<vmem>>, vector<5x128xf32>,
    } else {
    }
    %c0 = arith.constant 0 : index
    %c0_1 = arith.constant 0 : index
    %c0_2 = arith.constant 0 : index
    %3 = vector.load %arg2[%c0, %c0_1, %c0_2] : memref<5x64x48xbf16, #tpu.memory_space<vmem>>, vector<5x64x48xbf16>
    %4 = vector.shape_cast %3 : vector<5x64x48xbf16> to vector<320x48xbf16>
    %c0_3 = arith.constant 0 : index
    %c0_4 = arith.constant 0 : index
    %5 = vector.load %arg3[%c0_3, %c0_4] : memref<48x128xbf16, #tpu.memory_space<vmem>>, vector<48x128xbf16>
    %cst = arith.constant dense<0.000000e+00> : vector<320x128xf32>
    %6 = tpu.matmul %4, %5, %cst {dimension_numbers = #tpu.dot_dimension_numbers<[1], [0], [0], [1], [0, 0, 1, 1], [], []>} : vector<320x48xbf16>, vector<48x128xbf16>, vector<320x128xf32> -> vector<320x128xf32>
    %c0_5 = arith.constant 0 : index
    %c0_6 = arith.constant 0 : index
    %7 = vector.load %arg4[%c0_5, %c0_6] : memref<1x128xf32, #tpu.memory_space<vmem>>, vector<1x128xf32>
    %8 = vector.broadcast %7 : vector<1x128xf32> to vector<320x128xf32>
    %9 = arith.addf %6, %8 : vector<320x128xf32>
    %cst_7 = arith.constant 5.000000e-01 : f32
    %10 = vector.broadcast %cst_7 : f32 to vector<320x128xf32>
    %11 = arith.mulf %10, %9 : vector<320x128xf32>
    %cst_8 = arith.constant 4.471500e-02 : f32
    %12 = vector.broadcast %cst_8 : f32 to vector<320x128xf32>
    %13 = arith.mulf %12, %9 : vector<320x128xf32>
    %14 = arith.mulf %13, %9 : vector<320x128xf32>
    %15 = arith.mulf %14, %9 : vector<320x128xf32>
    %16 = arith.addf %9, %15 : vector<320x128xf32>
    %cst_9 = arith.constant 0.797884583 : f32
    %17 = vector.broadcast %cst_9 : f32 to vector<320x128xf32>
    %18 = arith.mulf %17, %16 : vector<320x128xf32>
    %19 = math.tanh %18 : vector<320x128xf32>
    %cst_10 = arith.constant 1.000000e+00 : f32
    %20 = vector.broadcast %cst_10 : f32 to vector<320x128xf32>
    %21 = arith.addf %20, %19 : vector<320x128xf32>
    %22 = arith.mulf %11, %21 : vector<320x128xf32>
    %c0_11 = arith.constant 0 : index
    %c0_12 = arith.constant 0 : index
    %23 = vector.load %arg8[%c0_11, %c0_12] : memref<5x128xf32, #tpu.memory_space<vmem>>, vector<5x128xf32>
    %24 = vector.shape_cast %22 : vector<320x128xf32> to vector<5x64x128xf32>
    %cst_13 = arith.constant dense<0.000000e+00> : vector<5x128xf32>
    %25 = vector.multi_reduction <add>, %24, %cst_13 [1] : vector<5x64x128xf32> to vector<5x128xf32>
    %26 = arith.addf %23, %25 : vector<5x128xf32>
    %c0_14 = arith.constant 0 : index
    %c0_15 = arith.constant 0 : index
    %27 = vector.load %arg8[%c0_14, %c0_15] : memref<5x128xf32, #tpu.memory_space<vmem>>, vector<5x128xf32>
    tpu.vector_store %arg8[%c0_14, %c0_15], %26 {strides = array<i32>} : memref<5x128xf32, #tpu.memory_space<vmem>>, vector<5x128xf32>,
    %c0_i32_16 = arith.constant 0 : i32
    %28 = arith.cmpi eq, %arg1, %c0_i32_16 : i32
    %29 = arith.extui %28 : i1 to i32
    %c0_i32_17 = arith.constant 0 : i32
    %30 = arith.cmpi ne, %29, %c0_i32_17 : i32
    scf.if %30 {
      %c0_18 = arith.constant 0 : index
      %c0_19 = arith.constant 0 : index
      %31 = vector.load %arg8[%c0_18, %c0_19] : memref<5x128xf32, #tpu.memory_space<vmem>>, vector<5x128xf32>
      %cst_20 = arith.constant 1.562500e-02 : f32
      %32 = vector.broadcast %cst_20 : f32 to vector<5x128xf32>
      %33 = arith.mulf %31, %32 : vector<5x128xf32>
      %cst_21 = arith.constant dense<0.000000e+00> : vector<5xf32>
      %34 = vector.multi_reduction <add>, %33, %cst_21 [1] : vector<5x128xf32> to vector<5xf32>
      %35 = vector.shape_cast %34 : vector<5xf32> to vector<5x1xf32>
      %cst_22 = arith.constant 1.280000e+02 : f32
      %36 = vector.broadcast %cst_22 : f32 to vector<5x1xf32>
      %37 = arith.divf %35, %36 : vector<5x1xf32>
      %38 = vector.broadcast %37 : vector<5x1xf32> to vector<5x128xf32>
      %39 = arith.subf %33, %38 : vector<5x128xf32>
      %40 = arith.mulf %39, %39 : vector<5x128xf32>
      %cst_23 = arith.constant dense<0.000000e+00> : vector<5xf32>
      %41 = vector.multi_reduction <add>, %40, %cst_23 [1] : vector<5x128xf32> to vector<5xf32>
      %42 = vector.shape_cast %41 : vector<5xf32> to vector<5x1xf32>
      %cst_24 = arith.constant 1.280000e+02 : f32
      %43 = vector.broadcast %cst_24 : f32 to vector<5x1xf32>
      %44 = arith.divf %42, %43 : vector<5x1xf32>
      %45 = vector.broadcast %37 : vector<5x1xf32> to vector<5x128xf32>
      %46 = arith.subf %33, %45 : vector<5x128xf32>
      %cst_25 = arith.constant 9.99999997E-7 : f32
      %47 = vector.broadcast %cst_25 : f32 to vector<5x1xf32>
      %48 = arith.addf %44, %47 : vector<5x1xf32>
      %49 = math.rsqrt %48 : vector<5x1xf32>
      %50 = vector.broadcast %49 : vector<5x1xf32> to vector<5x128xf32>
      %51 = arith.mulf %46, %50 : vector<5x128xf32>
      %c0_26 = arith.constant 0 : index
      %c0_27 = arith.constant 0 : index
      %52 = vector.load %arg5[%c0_26, %c0_27] : memref<1x128xf32, #tpu.memory_space<vmem>>, vector<1x128xf32>
      %53 = vector.broadcast %52 : vector<1x128xf32> to vector<5x128xf32>
      %54 = arith.mulf %51, %53 : vector<5x128xf32>
      %c0_28 = arith.constant 0 : index
      %c0_29 = arith.constant 0 : index
      %55 = vector.load %arg6[%c0_28, %c0_29] : memref<1x128xf32, #tpu.memory_space<vmem>>, vector<1x128xf32>
      %56 = vector.broadcast %55 : vector<1x128xf32> to vector<5x128xf32>
      %57 = arith.addf %54, %56 : vector<5x128xf32>
      %c0_30 = arith.constant 0 : index
      %c0_31 = arith.constant 0 : index
      %c0_32 = arith.constant 0 : index
      %58 = vector.load %arg7[%c0_30, %c0_31, %c0_32] : memref<1x5x128xf32, #tpu.memory_space<vmem>>, vector<1x5x128xf32>
      %59 = vector.shape_cast %58 : vector<1x5x128xf32> to vector<5x128xf32>
      %60 = vector.shape_cast %57 : vector<5x128xf32> to vector<1x5x128xf32>
      tpu.vector_store %arg7[%c0_30, %c0_31, %c0_32], %60 {strides = array<i32>} : memref<1x5x128xf32, #tpu.memory_space<vmem>>, vector<1x5x128xf32>,
    } else {
    }
    return
  }
  func.func @transform_0(%arg0: i32, %arg1: i32) -> (i32, i32, i32) {
    %c0_i32 = arith.constant 0 : i32
    %c0_i32_0 = arith.constant 0 : i32
    return %arg0, %arg1, %c0_i32 : i32, i32, i32
  }
  func.func @transform_1(%arg0: i32, %arg1: i32) -> (i32, i32) {
    %c0_i32 = arith.constant 0 : i32
    %c0_i32_0 = arith.constant 0 : i32
    %c0_i32_1 = arith.constant 0 : i32
    return %c0_i32, %c0_i32_0 : i32, i32
  }
  func.func @transform_2(%arg0: i32, %arg1: i32) -> (i32, i32) {
    %c0_i32 = arith.constant 0 : i32
    %c0_i32_0 = arith.constant 0 : i32
    %c0_i32_1 = arith.constant 0 : i32
    return %c0_i32, %c0_i32_0 : i32, i32
  }
  func.func @transform_3(%arg0: i32, %arg1: i32) -> (i32, i32) {
    %c0_i32 = arith.constant 0 : i32
    %c0_i32_0 = arith.constant 0 : i32
    %c0_i32_1 = arith.constant 0 : i32
    return %c0_i32, %c0_i32_0 : i32, i32
  }
  func.func @transform_4(%arg0: i32, %arg1: i32) -> (i32, i32) {
    %c0_i32 = arith.constant 0 : i32
    %c0_i32_0 = arith.constant 0 : i32
    %c0_i32_1 = arith.constant 0 : i32
    return %c0_i32, %c0_i32_0 : i32, i32
  }
  func.func @transform_5(%arg0: i32, %arg1: i32) -> (i32, i32, i32) {
    %c0_i32 = arith.constant 0 : i32
    %c0_i32_0 = arith.constant 0 : i32
    %c0_i32_1 = arith.constant 0 : i32
    return %arg0, %c0_i32, %c0_i32_0 : i32, i32, i32
  }
}

</mosaic_0001>

<bundles_post_ra>
// kernel: _lambda_.1
= control target key start
LH: loop header
LB: loop body
LE: loop exit
PB: predicated region body
PF: predicated region fallthrough
CT: control target
= control target key end

     0   :  { %10 = vsyncpa [#allocation4], 0  ;;  %s2799_s0 = inlined_call_operand.hbm [shape: bf16[10,64,48], index: 0, kind: input, shape index: {}]   ;;  %s2800_s1 = inlined_call_operand.hbm [shape: bf16[48,128], index: 1, kind: input, shape index: {}]   ;;  %s2801_s2 = inlined_call_operand.hbm [shape: f32[1,128], index: 2, kind: input, shape index: {}, may-alias: {2,4}]   ;;  %s2802_s3 = inlined_call_operand.hbm [shape: f32[1,128], index: 3, kind: input, shape index: {}]   ;;  %s2803_s4 = inlined_call_operand.hbm [shape: f32[1,128], index: 4, kind: input, shape index: {}, may-alias: {2,4}]   ;;  %s2804_s5 = inlined_call_operand.hbm [shape: f32[2,5,128], index: 5, kind: output, shape index: {}]  }
   0x1   :  { %12 = vsyncpa [#allocation4 + $0x1], 0 }
   0x2   :  { %13 = vsyncpa [#allocation7], 0 }
   0x3   :  { %14 = vsyncpa [#allocation10], 0 }
   0x4   :  { %15 = vsyncpa [#allocation5], 0 }
   0x5   :  { %17 = vsyncpa [#allocation5 + $0x1], 0  ;;  %s1987_s18 = smov 0   ;;  %s1989_s19 = smov 0  }
   0x6   :  { %s1991_s20 = smov 0   ;;  %s1993_s21 = smov 0  }
   0x7   :  { %s1995_s22 = smov 0   ;;  %s1997_s23 = smov 0  }
   0x8 LB: > { %2812 = sst [smem:[#allocation17_spill]] %s1926_s18  ;;  %s1357_s24 = sadd.s32 4294967295, %s1946_s23   ;;  %s1946_s23 = sphi %s1997_s23, %s23_s23   ;;  %s1942_s22 = sphi %s1995_s22, %s2841_s22   ;;  %s1938_s21 = sphi %s1993_s21, %s2840_s21   ;;  %s1934_s20 = sphi %s1991_s20, %s2839_s20   ;;  %s1930_s19 = sphi %s1989_s19, %s2838_s19   ;;  %s1926_s18 = sphi %s1987_s18, %s2837_s18  }
   0x9   : > { %s1358_s25 = sadd.s32 4294967294, %s1946_s23   ;;  %p57_p0 = scmp.ne.s32.totalorder %s1930_s19, %s1926_s18 }
   0xa   : > { %p2021_p1 = scmp.eq.s32.totalorder %s1357_s24, 0  ;;  %p2025_p2 = scmp.eq.s32.totalorder %s1357_s24, 1 }
   0xb   : > { %p171_p3 = scmp.eq.s32.totalorder %s1358_s25, 1  ;;  %p1359_p5 = scmp.ge.s32.totalorder %s1946_s23, 1 }
   0xc   : > { %s2813_s26 = scalar_select %p2021_p1, 1, 0 }
   0xd   : > { %s2814_s27 = scalar_select %p2025_p2, 1, 0 }
   0xe   : > { %p2031_p4 = por %p2021_p1, %p57_p0  ;;  %p2036_p6 = por %p171_p3, %p57_p0 }
   0xf   : > { %p178_p7 = scmp.lt.s32.totalorder %s1946_s23, 3  ;;  %s1948_s6 = smov [#allocation6]  }
  0x10   : > { %s2815_s28 = scalar_select %p2031_p4, 1, 0 }
  0x11   : > { %s2816_s29 = scalar_select %p2036_p6, 1, 0 }
  0x12   : > { %p2041_p8 = pnand %p1359_p5, %p178_p7  ;;  %s190_s7 = sshll.u32 %s1948_s6, 4  ;;  %s2045_s7 = int_to_ptr.vmem [resolvable:$true] %s190_s7 }
  0x13   : > { %2817 = sst [smem:[#allocation18_spill]] %s2816_s29  ;;  %s1949_s9 = smov [#allocation9]  }
  0x14   : > { %s2818_s30 = scalar_select %p2041_p8, 1, 0 }
  0x15   : > { %p1523_p9 = pneg %p2041_p8  ;;  %s215_s10 = sshll.u32 %s1949_s9, 4  ;;  %s2056_s10 = int_to_ptr.vmem [resolvable:$true] %s215_s10 }
  0x16   : > { %s1950_s11 = smov [#allocation8]   ;;  %s1714_s15 = scalar_lea.hbm %s2800_s1, 384 }
  0x17   : > { %p2052_p11 = pnand %p1523_p9, %p2021_p1  ;;  %s2058_s12 = sshll.u32 %s1950_s11, 4  ;;  %s205_s12 = int_to_ptr.vmem [resolvable:$true] %s2058_s12 }
  0x18   : > { %p1715_p12 = scmp.ne.s32.totalorder %s2800_s1, %s1714_s15  ;;  %p1721_p5 = scmp.lt.u32.totalorder %s1714_s15, %s2800_s1 }
  0x19   : > { %p2068_p13 = pneg %p2052_p11 }
  0x1b   : > { %p1717_p0 = pnand %p2068_p13, %p1715_p12 }
  0x1d   : > { %p1718_p3 = pneg %p1717_p0 }
  0x1f   : > { %p1723_p7 = pnand %p1721_p5, %p1718_p3 }
  0x21   : > { %1726 = shalt.err (!%p1723_p7)
}
  0x22   : > { %s1727_s9 = scalar_lea.vmem %s2045_s7, 384  ;;  %p1735_p1 = scmp.lt.s32.totalorder %s2045_s7, %s2045_s7 }
  0x23   : > { %p1728_p9 = scmp.ne.s32.totalorder %s2045_s7, %s1727_s9  ;;  %p1736_p4 = scmp.lt.s32.totalorder %s1727_s9, %s1727_s9 }
  0x25   : > { %p1730_p10 = pnand %p1728_p9, %p2068_p13  ;;  %p1737_p12 = por %p1736_p4, %p1735_p1 }
  0x27   : > { %p1731_p6 = pneg %p1730_p10 }
  0x29   : > { %p1738_p0 = pnand %p1737_p12, %p1731_p6 }
  0x2b   : > { %1741 = shalt.err (!%p1738_p0)
}
  0x2c   : > { %s1951_s11 = smov 64   ;;  %s1952_s13 = smov 4  }
  0x2d   : > { %1526 = dma.hbm_to_vmem [thread:$0]  (!%p2052_p11), %s2800_s1, 384, %s2045_s7, [#allocation7], %s1951_s11, %s1951_s11, %s1952_s13  }
  0x2e   : > { %s1742_s25 = scalar_lea.hbm %s2802_s3, 16 }
  0x2f   : > { %p1743_p1 = scmp.ne.s32.totalorder %s2802_s3, %s1742_s25  ;;  %p1749_p10 = scmp.lt.u32.totalorder %s1742_s25, %s2802_s3 }
  0x31   : > { %p1745_p4 = pnand %p1743_p1, %p2068_p13 }
  0x33   : > { %p1746_p6 = pneg %p1745_p4 }
  0x35   : > { %p1751_p3 = pnand %p1749_p10, %p1746_p6 }
  0x37   : > { %1754 = shalt.err (!%p1751_p3)
}
  0x38   : > { %s1755_s7 = scalar_lea.vmem %s2056_s10, 16  ;;  %s1762_s14 = scalar_lea.vmem %s2056_s10, 32 }
  0x39   : > { %p1756_p5 = scmp.ne.s32.totalorder %s2056_s10, %s1755_s7  ;;  %p1763_p12 = scmp.lt.s32.totalorder %s2056_s10, %s2056_s10 }
  0x3a   : > { %p1764_p0 = scmp.lt.s32.totalorder %s1762_s14, %s1755_s7 }
  0x3b   : > { %p1758_p7 = pnand %p1756_p5, %p2068_p13 }
  0x3c   : > { %p1765_p1 = por %p1764_p0, %p1763_p12 }
  0x3d   : > { %p1759_p9 = pneg %p1758_p7 }
  0x3f   : > { %p1766_p4 = pnand %p1765_p1, %p1759_p9 }
  0x41   : > { %1769 = shalt.err (!%p1766_p4)
}
  0x42   : > { %1532 = dma.hbm_to_vmem [thread:$0]  (!%p2052_p11), %s2802_s3, 16, %s2056_s10, [#allocation10]  }
  0x43   : > { %s1770_s17 = scalar_lea.hbm %s2801_s2, 16 }
  0x44   : > { %p1771_p6 = scmp.ne.s32.totalorder %s2801_s2, %s1770_s17  ;;  %p1777_p5 = scmp.lt.u32.totalorder %s1770_s17, %s2801_s2 }
  0x46   : > { %p1773_p10 = pnand %p1771_p6, %p2068_p13 }
  0x48   : > { %p1774_p3 = pneg %p1773_p10 }
  0x4a   : > { %p1779_p7 = pnand %p1777_p5, %p1774_p3 }
  0x4c   : > { %1782 = shalt.err (!%p1779_p7)
}
  0x4d   : > { %s1783_s14 = scalar_lea.vmem %s205_s12, 16  ;;  %s1790_s10 = scalar_lea.vmem %s205_s12, 32 }
  0x4e   : > { %p1784_p9 = scmp.ne.s32.totalorder %s205_s12, %s1783_s14  ;;  %p1791_p1 = scmp.lt.s32.totalorder %s205_s12, %s205_s12 }
  0x4f   : > { %p1792_p4 = scmp.lt.s32.totalorder %s1790_s10, %s1783_s14 }
  0x50   : > { %p1786_p12 = pnand %p1784_p9, %p2068_p13 }
  0x51   : > { %p1793_p8 = por %p1792_p4, %p1791_p1 }
  0x52   : > { %p1787_p0 = pneg %p1786_p12 }
  0x54   : > { %p1794_p2 = pnand %p1793_p8, %p1787_p0 }
  0x56   : > { %1797 = shalt.err (!%p1794_p2)
}
  0x57   : > { %1529 = dma.hbm_to_vmem [thread:$0]  (!%p2052_p11), %s2801_s2, 16, %s205_s12, [#allocation7]  }
  0x58   : > { %s1953_s15 = smov [#allocation11]   ;;  %s1798_s6 = scalar_lea.hbm %s2803_s4, 16 }
  0x59   : > { %s226_s16 = sshll.u32 %s1953_s15, 4  ;;  %p1799_p6 = scmp.ne.s32.totalorder %s2803_s4, %s1798_s6  ;;  %s227_s16 = int_to_ptr.vmem [resolvable:$true] %s226_s16 }
  0x5a   : > { %p1805_p10 = scmp.lt.u32.totalorder %s1798_s6, %s2803_s4 }
  0x5b   : > { %p1801_p2 = pnand %p1799_p6, %p2068_p13 }
  0x5d   : > { %p1802_p8 = pneg %p1801_p2 }
  0x5f   : > { %p1807_p3 = pnand %p1805_p10, %p1802_p8 }
  0x61   : > { %1810 = shalt.err (!%p1807_p3)
}
  0x62   : > { %s1811_s12 = scalar_lea.vmem %s227_s16, 16  ;;  %s1818_s18 = scalar_lea.vmem %s227_s16, 32 }
  0x63   : > { %p1812_p5 = scmp.ne.s32.totalorder %s227_s16, %s1811_s12  ;;  %p1819_p12 = scmp.lt.s32.totalorder %s227_s16, %s227_s16 }
  0x64   : > { %p1820_p0 = scmp.lt.s32.totalorder %s1818_s18, %s1811_s12 }
  0x65   : > { %p1814_p7 = pnand %p1812_p5, %p2068_p13 }
  0x66   : > { %p1821_p1 = por %p1820_p0, %p1819_p12 }
  0x67   : > { %p1815_p9 = pneg %p1814_p7 }
  0x69   : > { %p1822_p4 = pnand %p1821_p1, %p1815_p9 }
  0x6b   : > { %1825 = shalt.err (!%p1822_p4)
}
  0x6c   : > { %1535 = dma.hbm_to_vmem [thread:$0]  (!%p2052_p11), %s2803_s4, 16, %s227_s16, [#allocation10]  }
  0x6d   : > { %s35_s24 = sadd.s32 1, %s1942_s22  ;;  %s44_s17 = sadd.s32 1, %s1934_s20 }
  0x6e   : > { %p37_p13 = scmp.ge.s32.totalorder %s35_s24, 2  ;;  %p51_p6 = scmp.ne.s32.totalorder %s1934_s20, %s1930_s19 }
  0x6f   : > { %p52_p2 = scmp.eq.s32.totalorder %s1946_s23, 0  ;;  %p1548_p8 = scmp.lt.s32.totalorder %s1946_s23, 2 }
  0x70   : > { %s2843_s24 = smov (%p37_p13, %s35_s24), 0  ;;  %p2821_p3 = scmp.ne.s32.totalorder %s2814_s27, 0 }
  0x71   : > { %p53_p10 = por %p52_p2, %p51_p6  ;;  %s39_s25 = ssub.s32 %s1942_s22, %s2843_s24 }
  0x72   : > { %p2163_p5 = por %p2821_p3, %p51_p6  ;;  %s237_s6 = sand.u32 1, %s1934_s20  }
  0x73   : > { %p42_p7 = scmp.eq.s32.totalorder %s39_s25, 0  ;;  %s1501_s16 = smul.u32 160, %s237_s6 }
  0x74   : > { %p2170_p11 = pnand %p1548_p8, %p53_p10  ;;  %s1425_s14 = smul.u32 2560, %s1942_s22 }
  0x75   : > { %s2175_s7 = scalar_select %p42_p7, %s1934_s20, %s44_s17  }
  0x76   : > { %s241_s10 = scalar_lea.vmem [#allocation3], %s1501_s16  ;;  %s2181_s29 = scalar_lea.hbm %s2799_s0, %s1425_s14 }
  0x77   : > { %s251_s12 = sshll.u32 %s241_s10, 4  ;;  %s2185_s15 = scalar_lea.sflag [#allocation4], %s237_s6  ;;  %s2183_s12 = int_to_ptr.vmem [resolvable:$true] %s251_s12 }
  0x78   : > { %s1826_s25 = scalar_lea.hbm %s2181_s29, 2560  ;;  %p1828_p12 = pneg %p2170_p11 }
  0x79   : > { %p1827_p9 = scmp.ne.s32.totalorder %s2181_s29, %s1826_s25  ;;  %s1831_s14 = scalar_lea.hbm %s2799_s0, 5120 }
  0x7a   : > { %p1832_p4 = scmp.lt.u32.totalorder %s2181_s29, %s2799_s0  ;;  %p1833_p13 = scmp.lt.u32.totalorder %s1831_s14, %s1826_s25 }
  0x7b   : > { %p1829_p0 = pnand %p1828_p12, %p1827_p9  ;;  %p1835_p2 = scmp.lt.u32.totalorder %s1826_s25, %s2181_s29 }
  0x7c   : > { %p1834_p6 = por %p1833_p13, %p1832_p4 }
  0x7d   : > { %p1830_p1 = pneg %p1829_p0 }
  0x7e   : > { %p1836_p8 = por %p1835_p2, %p1834_p6 }
  0x80   : > { %p1837_p10 = pnand %p1836_p8, %p1830_p1 }
  0x82   : > { %1840 = shalt.err (!%p1837_p10)
}
  0x83   : > { %s1841_s6 = scalar_lea.vmem %s2183_s12, 2560  ;;  %s1954_s18 = smov [#allocation3]  }
  0x84   : > { %p1842_p3 = scmp.ne.s32.totalorder %s2183_s12, %s1841_s6  ;;  %s1846_s17 = sshll.u32 %s1954_s18, 4  ;;  %s1847_s17 = int_to_ptr.vmem [resolvable:$false] %s1846_s17 }
  0x85   : > { %s1848_s16 = scalar_lea.vmem %s1847_s17, 5120  ;;  %p1849_p0 = scmp.lt.s32.totalorder %s2183_s12, %s1847_s17 }
  0x86   : > { %p1844_p7 = pnand %p1842_p3, %p1828_p12  ;;  %p1850_p4 = scmp.lt.s32.totalorder %s1848_s16, %s1841_s6 }
  0x88   : > { %p1845_p9 = pneg %p1844_p7  ;;  %p1851_p13 = por %p1850_p4, %p1849_p0 }
  0x8a   : > { %p1852_p6 = pnand %p1851_p13, %p1845_p9 }
  0x8c   : > { %1855 = shalt.err (!%p1852_p6)
}
  0x8d   : > { %1539 = dma.hbm_to_vmem [thread:$0]  (!%p2170_p11), %s2181_s29, 2560, %s2183_s12, %s2185_s15, %s1951_s11, %s1951_s11, %s1952_s13  }
  0x8e   : > { %p2824_p12 = scmp.ne.s32.totalorder %s2818_s30, 0 }
  0x90   : > { %263 = sbr.rel (%p2824_p12) target bundleno = 868 (0x364), region = 40 }
  0x97   : > { %s2219_s25 = sand.u32 1, %s1930_s19   ;;  %p2825_p1 = scmp.ne.s32.totalorder %s2815_s28, 0 }
  0x98   : > { %s1502_s14 = smul.u32 160, %s2219_s25  ;;  %s266_s10 = scalar_lea.sflag [#allocation4], %s2219_s25 }
  0x9a   : > { %s2223_s27 = scalar_lea.vmem [#allocation3], %s1502_s14 }
  0x9b   : > { %1909 = dma.done.wait (%p2825_p1), %s266_s10, 2560  }
  0x9c   : > { %1911 = vsyncadd (%p2825_p1), %s266_s10, 4294964736  ;;  %p2826_p11 = scmp.ne.s32.totalorder %s2813_s26, 0 }
  0x9e   : > { %1913 = dma.done.wait (%p2826_p11), [#allocation7], 400  }
  0x9f   : > { %1915 = vsyncadd (%p2826_p11), [#allocation7], 4294966896 }
  0xa0   : > { %1917 = dma.done.wait (%p2826_p11), [#allocation10], 32  }
  0xa1   : > { %1919 = vsyncadd (%p2826_p11), [#allocation10], 4294967264  ;;  %v1609_v0 = vld [vmem:[#allocation6] sm:$0xff]   ;;  %v1610_v1 = vld [vmem:[#allocation6 + $0x8] sm:$0xff]   ;;  %vm491_vm0 = vcmask 392192   ;;  %vm1176_vm1 = vcmask 1041409  }
  0xa2   : > { %1449 = vmatprep.subr.bf16.mxu0 %v1609_v0  ;;  %1495 = vmatprep.subr.bf16.mxu1 %v1609_v0  ;;  %v1611_v2 = vld [vmem:[#allocation6 + $0x10] sm:$0xff]   ;;  %v1612_v3 = vld [vmem:[%s2223_s27] sm:$0xff]   ;;  %v1614_v5 = vld [vmem:[%s2223_s27 + $0x8] sm:$0xff]   ;;  %vm1178_vm2 = vcmask 1042434   ;;  %vm1180_vm3 = vcmask 1043459   ;;  %vm1182_vm4 = vcmask 1044484  }
  0xa3   : > { %1450 = vmatpush3.bf16.msra.mxu0 %v1609_v0  ;;  %1498 = vmatpush3.bf16.msra.mxu1 %v1609_v0  ;;  %v1613_v4 = vld [vmem:[%s2223_s27 + $0x50] sm:$0xff]   ;;  %v1615_v6 = vld [vmem:[%s2223_s27 + $0x58] sm:$0xff]   ;;  %v1617_v8 = vld [vmem:[%s2223_s27 + $0x60] sm:$0xff]   ;;  %vm1192_vm5 = vcmask 1044480   ;;  %s1372_s26 = sshll.u32 %s2219_s25, 3  ;;  %s1420_s28 = sshll.u32 %s1938_s21, 7 }
  0xa4   : > { %1451 = vmatprep.subr.bf16.mxu0 %v1610_v1  ;;  %1496 = vmatprep.subr.bf16.mxu1 %v1610_v1  ;;  %v1616_v7 = vld [vmem:[%s2223_s27 + $0x10] sm:$0xff]   ;;  %v1618_v9 = vld [vmem:[%s2223_s27 + $0x18] sm:$0xff]   ;;  %v1619_v10 = vld [vmem:[%s2223_s27 + $0x68] sm:$0xff]   ;;  %s311_s30 = scalar_lea.vmem [#allocation12], %s1372_s26  ;;  %s2750_s12 = scalar_lea.hbm %s2804_s5, %s1420_s28 }
  0xa5   : > { %1455 = vmatprep.mubr.msk.bf16.mxu0 %vm491_vm0, %v1612_v3  ;;  %1475 = vmatprep.mubr.msk.bf16.mxu1 %vm491_vm0, %v1613_v4  ;;  %v1620_v11 = vld [vmem:[%s2223_s27 + $0x20] sm:$0xff]   ;;  %v1621_v12 = vld [vmem:[%s2223_s27 + $0x70] sm:$0xff]   ;;  %v1622_v13 = vld [vmem:[%s2223_s27 + $0x28] sm:$0xff]   ;;  %s1238_s11 = sshll.u32 %s311_s30, 4  ;;  %s1225_s29 = scalar_lea.sflag [#allocation5], %s2219_s25  ;;  %s2752_s11 = int_to_ptr.vmem [resolvable:$true] %s1238_s11 }
  0xa6   : > { %v1623_v14 = vld [vmem:[%s2223_s27 + $0x78] sm:$0xff]   ;;  %v1624_v15 = vld [vmem:[%s2223_s27 + $0x30] sm:$0xff]   ;;  %v1625_v16 = vld [vmem:[%s2223_s27 + $0x80] sm:$0xff]   ;;  %s1856_s15 = scalar_lea.vmem %s2752_s11, 128  ;;  %s1956_s21 = smov [#allocation12]  }
  0xa7   : > { %1452 = vmatpush3.bf16.msra.mxu0 %v1610_v1  ;;  %1499 = vmatpush3.bf16.msra.mxu1 %v1610_v1  ;;  %v1626_v17 = vld [vmem:[%s2223_s27 + $0x38] sm:$0xff]   ;;  %v1627_v18 = vld [vmem:[%s2223_s27 + $0x88] sm:$0xff]   ;;  %v1628_v19 = vld [vmem:[%s2223_s27 + $0x40] sm:$0xff]   ;;  %p1857_p2 = scmp.ne.s32.totalorder %s2752_s11, %s1856_s15  ;;  %s1860_s6 = sshll.u32 %s1956_s21, 4  ;;  %s1861_s6 = int_to_ptr.vmem [resolvable:$false] %s1860_s6 }
  0xa8   : > { %1453 = vmatprep.subr.bf16.mxu0 %v1611_v2  ;;  %1497 = vmatprep.subr.bf16.mxu1 %v1611_v2  ;;  %v1629_v20 = vld [vmem:[%s2223_s27 + $0x90] sm:$0xff]   ;;  %v1630_v21 = vld [vmem:[%s2223_s27 + $0x48] sm:$0xff]   ;;  %v1631_v22 = vld [vmem:[%s2223_s27 + $0x98] sm:$0xff]   ;;  %s1862_s18 = scalar_lea.vmem %s1861_s6, 256  ;;  %p1863_p3 = scmp.lt.s32.totalorder %s2752_s11, %s1861_s6 }
  0xa9   : > { %v2277_v23 = vld [vmem:[#allocation8] ss:$0 sm:$0xff]  ;;  %p1858_p8 = pnand %p1857_p2, %p2163_p5  ;;  %p1864_p7 = scmp.lt.s32.totalorder %s1862_s18, %s1856_s15 }
  0xab   : > { %1454 = vmatpush3.bf16.msra.mxu0 %v1611_v2  ;;  %1500 = vmatpush3.bf16.msra.mxu1 %v1611_v2  ;;  %p1859_p10 = pneg %p1858_p8  ;;  %p1865_p9 = por %p1864_p7, %p1863_p3 }
  0xad   : > { %p1866_p0 = pnand %p1865_p9, %p1859_p10 }
  0xae   : > { %1456 = vmatmul.mubr.msk.bf16.vlgmr.msra.gmra.mrb[0].mxu0 %vm491_vm0, %v1614_v5  ;;  %1476 = vmatmul.mubr.msk.bf16.vlgmr.msra.gmra.mrb[0].mxu1 %vm491_vm0, %v1615_v6 }
  0xaf   : > { %1459 = vmatprep.mubr.msk.bf16.mxu0 %vm491_vm0, %v1616_v7  ;;  %1479 = vmatprep.mubr.msk.bf16.mxu1 %vm491_vm0, %v1617_v8 }
  0xb6   : > { %1460 = vmatmul.mubr.msk.bf16.gmra.mrb[4].mxu0 %vm491_vm0, %v1618_v9  ;;  %1480 = vmatmul.mubr.msk.bf16.gmra.mrb[4].mxu1 %vm491_vm0, %v1619_v10 }
  0xb7   : > { %1463 = vmatprep.mubr.msk.bf16.mxu0 %vm491_vm0, %v1620_v11  ;;  %1483 = vmatprep.mubr.msk.bf16.mxu1 %vm491_vm0, %v1621_v12 }
  0xbe   : > { %1464 = vmatmul.mubr.msk.bf16.gmra.mrb[8].mxu0 %vm491_vm0, %v1622_v13  ;;  %1484 = vmatmul.mubr.msk.bf16.gmra.mrb[8].mxu1 %vm491_vm0, %v1623_v14 }
  0xbf   : > { %1467 = vmatprep.mubr.msk.bf16.mxu0 %vm491_vm0, %v1624_v15  ;;  %1487 = vmatprep.mubr.msk.bf16.mxu1 %vm491_vm0, %v1625_v16 }
  0xc6   : > { %1468 = vmatmul.mubr.msk.bf16.gmra.mrb[12].mxu0 %vm491_vm0, %v1626_v17  ;;  %1488 = vmatmul.mubr.msk.bf16.gmra.mrb[12].mxu1 %vm491_vm0, %v1627_v18 }
  0xc7   : > { %1471 = vmatprep.mubr.msk.bf16.mxu0 %vm491_vm0, %v1628_v19  ;;  %1491 = vmatprep.mubr.msk.bf16.mxu1 %vm491_vm0, %v1629_v20 }
  0xce   : > { %1472 = vmatmul.mubr.msk.bf16.gmra.mrb[16].mxu0 %vm491_vm0, %v1630_v21  ;;  %1492 = vmatmul.mubr.msk.bf16.gmra.mrb[16].mxu1 %vm491_vm0, %v1631_v22 }
 0x181   : > { %v1457_v24 = vpop.f32.mrb[0].mxu0  ;;  %v1477_v25 = vpop.f32.mrb[0].mxu1 }
 0x182   : > { %v2280_v26 = vadd.f32 %v1457_v24, %v2277_v23  ;;  %v586_v27 = vpop.f32.mrb[1].mxu0  ;;  %v666_v28 = vpop.f32.mrb[1].mxu1  ;;  %v2317_v61 = vadd.f32 %v1477_v25, %v2277_v23 }
 0x183   : > { %v2283_v29 = vadd.f32 %v2277_v23, %v586_v27  ;;  %v1458_v30 = vpop.f32.mrb[2].mxu0  ;;  %v2285_v31 = vpop.f32.mrb[2].mxu1  ;;  %v2330_v5 = vadd.f32 %v2277_v23, %v666_v28 }
 0x184   : > { %v787_v32 = vmul.f32 0.044715, %v2280_v26  ;;  %v2291_v35 = vadd.f32 %v1458_v30, %v2277_v23  ;;  %v589_v36 = vpop.f32.mrb[3].mxu0  ;;  %v2293_v37 = vpop.f32.mrb[3].mxu1  ;;  %v807_v9 = vmul.f32 0.044715, %v2317_v61 }
 0x185   : > { %v785_v33 = vmul.f32 0.044715, %v2283_v29  ;;  %v2297_v39 = vadd.f32 %v2277_v23, %v589_v36  ;;  %2827 = vst [vmem:[#allocation19_spill] sm:$0xff] %v2330_v5  ;;  %v805_v22 = vmul.f32 0.044715, %v2330_v5 }
 0x186   : > { %v827_v34 = vmul.f32 %v787_v32, %v2280_v26  ;;  %v788_v41 = vmul.f32 0.044715, %v2291_v35  ;;  %v847_v28 = vmul.f32 %v807_v9, %v2317_v61 }
 0x187   : > { %v825_v38 = vmul.f32 %v785_v33, %v2283_v29  ;;  %v786_v50 = vmul.f32 0.044715, %v2297_v39 }
 0x188   : > { %v867_v40 = vmul.f32 %v827_v34, %v2280_v26  ;;  %v828_v46 = vmul.f32 %v788_v41, %v2291_v35 }
 0x189   : > { %v865_v42 = vmul.f32 %v825_v38, %v2283_v29  ;;  %v1461_v43 = vpop.f32.mrb[4].mxu0  ;;  %v1481_v44 = vpop.f32.mrb[4].mxu1  ;;  %v826_v56 = vmul.f32 %v786_v50, %v2297_v39 }
 0x18a   : > { %v907_v45 = vadd.f32 %v867_v40, %v2280_v26  ;;  %v602_v47 = vpop.f32.mrb[5].mxu0  ;;  %v682_v48 = vpop.f32.mrb[5].mxu1  ;;  %v868_v53 = vmul.f32 %v828_v46, %v2291_v35  ;;  %v2314_v60 = vadd.f32 %v1461_v43, %v2277_v23  ;;  %v2321_v63 = vadd.f32 %v1481_v44, %v2277_v23 }
 0x18b   : > { %v905_v49 = vadd.f32 %v865_v42, %v2283_v29  ;;  %v1462_v51 = vpop.f32.mrb[6].mxu0  ;;  %v1482_v52 = vpop.f32.mrb[6].mxu1  ;;  %v866_v62 = vmul.f32 %v826_v56, %v2297_v39  ;;  %v2340_v12 = vadd.f32 %v2277_v23, %v602_v47  ;;  %v2348_v16 = vadd.f32 %v2277_v23, %v682_v48 }
 0x18c   : > { %v2307_v54 = vpop.f32.mrb[7].mxu0  ;;  %v2310_v57 = vpop.f32.mrb[7].mxu1  ;;  %v947_v58 = vmul.f32 0.7978846, %v907_v45  ;;  %v908_v59 = vadd.f32 %v868_v53, %v2291_v35  ;;  %v791_v2 = vmul.f32 0.044715, %v2314_v60  ;;  %v2351_v17 = vadd.f32 %v1462_v51, %v2277_v23 }
 0x18d   : > { %v945_v55 = vmul.f32 0.7978846, %v905_v49  ;;  %v906_v1 = vadd.f32 %v866_v62, %v2297_v39  ;;  %v811_v6 = vmul.f32 0.044715, %v2321_v63  ;;  %v789_v21 = vmul.f32 0.044715, %v2340_v12 }
 0x18e   : > { %v948_v0 = vmul.f32 0.7978846, %v908_v59  ;;  %v831_v11 = vmul.f32 %v791_v2, %v2314_v60  ;;  %v809_v24 = vmul.f32 0.044715, %v2348_v16  ;;  %v792_v27 = vmul.f32 0.044715, %v2351_v17 }
 0x18f   : > { %1632 = vtanh.f32 %v945_v55  ;;  %v946_v10 = vmul.f32 0.7978846, %v906_v1  ;;  %v851_v15 = vmul.f32 %v811_v6, %v2321_v63  ;;  %v829_v25 = vmul.f32 %v789_v21, %v2340_v12 }
 0x190   : > { %1634 = vtanh.f32 %v947_v58  ;;  %v871_v20 = vmul.f32 %v831_v11, %v2314_v60  ;;  %v849_v32 = vmul.f32 %v809_v24, %v2348_v16  ;;  %v832_v36 = vmul.f32 %v792_v27, %v2351_v17 }
 0x191   : > { %v2325_v3 = vpop.f32.mrb[8].mxu0  ;;  %v2327_v4 = vpop.f32.mrb[8].mxu1  ;;  %1636 = vtanh.f32 %v948_v0  ;;  %v891_v30 = vmul.f32 %v851_v15, %v2321_v63  ;;  %v869_v34 = vmul.f32 %v829_v25, %v2340_v12  ;;  %v845_v42 = vmul.f32 %v805_v22, %v2330_v5 }
 0x192   : > { %v2333_v7 = vpop.f32.mrb[9].mxu0  ;;  %v2335_v8 = vpop.f32.mrb[9].mxu1  ;;  %1638 = vtanh.f32 %v946_v10  ;;  %v911_v33 = vadd.f32 %v871_v20, %v2314_v60  ;;  %v2375_v43 = vadd.f32 %v1482_v52, %v2277_v23  ;;  %v747_v46 = vmul.f32 0.5, %v2280_v26 }
 0x193   : > { %v2342_v13 = vpop.f32.mrb[10].mxu0  ;;  %v2344_v14 = vpop.f32.mrb[10].mxu1  ;;  %v745_v47 = vmul.f32 0.5, %v2283_v29  ;;  %v909_v48 = vadd.f32 %v869_v34, %v2340_v12  ;;  %v889_v49 = vmul.f32 %v849_v32, %v2348_v16  ;;  %v2390_v52 = vmul.f32 %v847_v28, %v2317_v61 }
 0x194   : > { %v2353_v18 = vpop.f32.mrb[11].mxu0  ;;  %v2355_v19 = vpop.f32.mrb[11].mxu1  ;;  %v2394_v55 = vadd.f32 %v2285_v31, %v2277_v23  ;;  %v2398_v26 = vadd.f32 %v2277_v23, %v2293_v37  ;;  %v931_v29 = vadd.f32 %v891_v30, %v2321_v63  ;;  %v951_v62 = vmul.f32 0.7978846, %v911_v33 }
 0x195   : > { %v949_v0 = vmul.f32 0.7978846, %v909_v48  ;;  %v872_v1 = vmul.f32 %v832_v36, %v2351_v17  ;;  %v2407_v6 = vmul.f32 %v845_v42, %v2330_v5  ;;  %v748_v31 = vmul.f32 0.5, %v2291_v35 }
 0x196   : > { %v746_v37 = vmul.f32 0.5, %v2297_v39  ;;  %v812_v9 = vmul.f32 0.044715, %v2375_v43  ;;  %v929_v15 = vadd.f32 %v889_v49, %v2348_v16  ;;  %v2415_v20 = vadd.f32 %v2277_v23, %v2307_v54 }
 0x197   : > { %1640 = vtanh.f32 %v949_v0  ;;  %v971_v22 = vmul.f32 0.7978846, %v931_v29  ;;  %v912_v24 = vadd.f32 %v872_v1, %v2351_v17  ;;  %v2422_v27 = vadd.f32 %v2277_v23, %v2310_v57 }
 0x198   : > { %v852_v25 = vmul.f32 %v812_v9, %v2375_v43  ;;  %1642 = vtanh.f32 %v951_v62  ;;  %v790_v39 = vmul.f32 0.044715, %v2415_v20  ;;  %v2429_v33 = vadd.f32 %v2325_v3, %v2277_v23 }
 0x199   : > { %v2369_v38 = vpop.f32.mrb[12].mxu0  ;;  %v2371_v40 = vpop.f32.mrb[12].mxu1  ;;  %v969_v42 = vmul.f32 0.7978846, %v929_v15  ;;  %v2438_v57 = vadd.f32 %v2327_v4, %v2277_v23  ;;  %v952_v29 = vmul.f32 0.7978846, %v912_v24  ;;  %1644 = vtanh.f32 %v971_v22 }
 0x19a   : > { %v1633_v41 = vpop.eup %1632  ;;  %v2377_v44 = vpop.f32.mrb[13].mxu0  ;;  %v892_v54 = vmul.f32 %v852_v25, %v2375_v43  ;;  %v806_v0 = vmul.f32 0.044715, %v2398_v26  ;;  %v795_v1 = vmul.f32 0.044715, %v2429_v33 }
 0x19b   : > { %v2379_v45 = vpop.f32.mrb[13].mxu1  ;;  %v2385_v50 = vpop.f32.mrb[14].mxu0  ;;  %v1025_v59 = vadd.f32 1.0, %v1633_v41  ;;  %1646 = vtanh.f32 %v969_v42  ;;  %v815_v24 = vmul.f32 0.044715, %v2438_v57 }
 0x19c   : > { %v2387_v51 = vpop.f32.mrb[14].mxu1  ;;  %v1635_v53 = vpop.eup %1634  ;;  %v932_v3 = vadd.f32 %v892_v54, %v2375_v43  ;;  %v2460_v22 = vmul.f32 0.044715, %v2394_v55  ;;  %1648 = vtanh.f32 %v952_v29  ;;  %v2473_v29 = vadd.f32 %v2407_v6, %v2330_v5 }
 0x19d   : > { %v2401_v56 = vpop.f32.mrb[15].mxu0  ;;  %v2403_v58 = vpop.f32.mrb[15].mxu1  ;;  %v1027_v11 = vadd.f32 1.0, %v1635_v53  ;;  %v1065_v35 = vmul.f32 %v1025_v59, %v745_v47  ;;  %v830_v47 = vmul.f32 %v790_v39, %v2415_v20  ;;  %v810_v59 = vmul.f32 0.044715, %v2422_v27 }
 0x19e   : > { %v1637_v2 = vpop.eup %1636  ;;  %v855_v42 = vmul.f32 %v815_v24, %v2438_v57  ;;  %v769_v6 = vmul.f32 0.5, %v2348_v16  ;;  %v2498_v16 = vadd.f32 %v2342_v13, %v2277_v23 }
 0x19f   : > { %v1639_v10 = vpop.eup %1638  ;;  %v1028_v30 = vadd.f32 1.0, %v1637_v2  ;;  %v1067_v41 = vmul.f32 %v1027_v11, %v747_v46  ;;  %v870_v4 = vmul.f32 %v830_v47, %v2415_v20  ;;  %v850_v11 = vmul.f32 %v810_v59, %v2422_v27 }
 0x1a0   : > { %v1026_v21 = vadd.f32 1.0, %v1639_v10  ;;  %v972_v10 = vmul.f32 0.7978846, %v932_v3  ;;  %v2469_v47 = vadd.f32 %v2277_v23, %v2333_v7  ;;  %v2480_v3 = vadd.f32 %v2277_v23, %v2335_v8 }
 0x1a1   : > { %v2424_v28 = vpop.f32.mrb[16].mxu0  ;;  %v2431_v34 = vpop.f32.mrb[16].mxu1  ;;  %v910_v15 = vadd.f32 %v870_v4, %v2415_v20  ;;  %v751_v59 = vmul.f32 0.5, %v2314_v60  ;;  %v895_v8 = vmul.f32 %v855_v42, %v2438_v57  ;;  %v796_v13 = vmul.f32 0.044715, %v2498_v16 }
 0x1a2   : > { %v1066_v32 = vmul.f32 %v1026_v21, %v746_v37  ;;  %v2433_v36 = vpop.f32.mrb[17].mxu0  ;;  %v2440_v48 = vpop.f32.mrb[17].mxu1  ;;  %v1068_v37 = vmul.f32 %v1028_v30, %v748_v31  ;;  %v835_v21 = vmul.f32 %v795_v1, %v2429_v33  ;;  %v749_v31 = vmul.f32 0.5, %v2340_v12 }
 0x1a3   : > { %v2442_v49 = vpop.f32.mrb[18].mxu0  ;;  %v2446_v62 = vpop.f32.mrb[18].mxu1  ;;  %1650 = vtanh.f32 %v972_v10  ;;  %v950_v30 = vmul.f32 0.7978846, %v910_v15  ;;  %v2476_v12 = vmul.f32 %v806_v0, %v2398_v26  ;;  %v793_v7 = vmul.f32 0.044715, %v2469_v47 }
 0x1a4   : > { %v1106_v53 = vadd.f32 %v1066_v32, %v1065_v35  ;;  %v2448_v46 = vpop.f32.mrb[19].mxu0  ;;  %v2453_v2 = vpop.f32.mrb[19].mxu1  ;;  %v890_v35 = vmul.f32 %v850_v11, %v2422_v27  ;;  %v875_v32 = vmul.f32 %v835_v21, %v2429_v33  ;;  %v772_v21 = vmul.f32 0.5, %v2375_v43 }
 0x1a5   : > { %2828 = vst [vmem:[#allocation20_spill] sm:$0xff] %v2448_v46  ;;  %2829 = vst [vmem:[#allocation21_spill] sm:$0xff] %v2453_v2  ;;  %v1641_v39 = vpop.eup %1640  ;;  %1652 = vtanh.f32 %v950_v30  ;;  %v833_v60 = vmul.f32 %v793_v7, %v2469_v47  ;;  %v770_v43 = vmul.f32 0.5, %v2422_v27 }
 0x1a6   : > { %v1107_v9 = vadd.f32 %v1106_v53, %v1067_v41  ;;  %v1029_v54 = vadd.f32 1.0, %v1641_v39  ;;  %v930_v41 = vadd.f32 %v890_v35, %v2422_v27  ;;  %v1643_v53 = vpop.eup %1642  ;;  %v915_v0 = vadd.f32 %v875_v32, %v2429_v33 }
 0x1a7   : > { %v1645_v11 = vpop.eup %1644  ;;  %v1031_v15 = vadd.f32 1.0, %v1643_v53  ;;  %v873_v24 = vmul.f32 %v833_v60, %v2469_v47  ;;  %v2508_v35 = vadd.f32 %v2277_v23, %v2353_v18  ;;  %v2522_v60 = vadd.f32 %v2277_v23, %v2355_v19 }
 0x1a8   : > { %v1108_v25 = vadd.f32 %v1107_v9, %v1068_v37  ;;  %v1069_v4 = vmul.f32 %v1029_v54, %v749_v31  ;;  %v970_v1 = vmul.f32 0.7978846, %v930_v41  ;;  %v2485_v37 = vmul.f32 0.5, %v2321_v63  ;;  %v1647_v39 = vpop.eup %1646 }
 0x1a9   : > { %v2489_v9 = vmul.f32 0.5, %v2351_v17  ;;  %v813_v63 = vmul.f32 0.044715, %v2480_v3  ;;  %v750_v17 = vmul.f32 0.5, %v2415_v20  ;;  %v955_v31 = vmul.f32 0.7978846, %v915_v0  ;;  %v1649_v32 = vpop.eup %1648 }
 0x1aa   : > { %v1109_v10 = vadd.f32 %v1108_v25, %v1069_v4  ;;  %1654 = vtanh.f32 %v970_v1  ;;  %v2504_v25 = vadd.f32 %v2344_v14, %v2277_v23  ;;  %v1051_v20 = vadd.f32 1.0, %v1645_v11 }
 0x1ab   : > { %v853_v30 = vmul.f32 %v813_v63, %v2480_v3  ;;  %v935_v54 = vadd.f32 %v895_v8, %v2438_v57  ;;  %v913_v41 = vadd.f32 %v873_v24, %v2469_v47  ;;  %v1071_v53 = vmul.f32 %v1031_v15, %v751_v59 }
 0x1ac   : > { %v816_v14 = vmul.f32 0.044715, %v2504_v25  ;;  %v836_v4 = vmul.f32 %v796_v13, %v2498_v16  ;;  %v794_v27 = vmul.f32 0.044715, %v2508_v35  ;;  %v1049_v1 = vadd.f32 1.0, %v1647_v39 }
 0x1ad   : > { %v1651_v42 = vpop.eup %1650  ;;  %v893_v18 = vmul.f32 %v853_v30, %v2480_v3  ;;  %v953_v7 = vmul.f32 0.7978846, %v913_v41  ;;  %1656 = vtanh.f32 %v955_v31  ;;  %v975_v24 = vmul.f32 0.7978846, %v935_v54 }
 0x1ae   : > { %v856_v0 = vmul.f32 %v816_v14, %v2504_v25  ;;  %v876_v59 = vmul.f32 %v836_v4, %v2498_v16  ;;  %v834_v15 = vmul.f32 %v794_v27, %v2508_v35  ;;  %v2530_v39 = vadd.f32 %v2369_v38, %v2277_v23 }
 0x1af   : > { %v1653_v8 = vpop.eup %1652  ;;  %v933_v11 = vadd.f32 %v893_v18, %v2480_v3  ;;  %v814_v31 = vmul.f32 0.044715, %v2522_v60  ;;  %v1032_v18 = vadd.f32 1.0, %v1649_v32  ;;  %v1052_v4 = vadd.f32 1.0, %v1651_v42 }
 0x1b0   : > { %v1030_v63 = vadd.f32 1.0, %v1653_v8  ;;  %v896_v30 = vmul.f32 %v856_v0, %v2504_v25  ;;  %v916_v19 = vadd.f32 %v876_v59, %v2498_v16  ;;  %v874_v41 = vmul.f32 %v834_v15, %v2508_v35 }
 0x1b1   : > { %v973_v13 = vmul.f32 0.7978846, %v933_v11  ;;  %1658 = vtanh.f32 %v953_v7  ;;  %v1089_v8 = vmul.f32 %v1049_v1, %v769_v6  ;;  %v854_v59 = vmul.f32 %v814_v31, %v2522_v60 }
 0x1b2   : > { %v1070_v5 = vmul.f32 %v1030_v63, %v750_v17  ;;  %v956_v54 = vmul.f32 0.7978846, %v916_v19  ;;  %v914_v0 = vadd.f32 %v874_v41, %v2508_v35  ;;  %v936_v11 = vadd.f32 %v896_v30, %v2504_v25 }
 0x1b3   : > { %1660 = vtanh.f32 %v973_v13  ;;  %v799_v46 = vmul.f32 0.044715, %v2530_v39  ;;  %v1091_v32 = vmul.f32 %v1051_v20, %v2485_v37  ;;  %v1072_v17 = vmul.f32 %v1032_v18, %v2489_v9 }
 0x1b4   : > { %v1655_v14 = vpop.eup %1654  ;;  %v1110_v38 = vadd.f32 %v1109_v10, %v1070_v5  ;;  %1662 = vtanh.f32 %v975_v24  ;;  %v954_v15 = vmul.f32 0.7978846, %v914_v0  ;;  %v1092_v7 = vmul.f32 %v1052_v4, %v772_v21 }
 0x1b5   : > { %v1050_v27 = vadd.f32 1.0, %v1655_v14  ;;  %1664 = vtanh.f32 %v956_v54  ;;  %v894_v5 = vmul.f32 %v854_v59, %v2522_v60  ;;  %v976_v10 = vmul.f32 0.7978846, %v936_v11 }
 0x1b6   : > { %v1111_v42 = vadd.f32 %v1110_v38, %v1071_v53  ;;  %1666 = vtanh.f32 %v954_v15  ;;  %v2550_v1 = vadd.f32 %v2277_v23, %v2377_v44  ;;  %v2556_v21 = vadd.f32 %v2277_v23, %v2379_v45 }
 0x1b7   : > { %v1090_v2 = vmul.f32 %v1050_v27, %v770_v43  ;;  %v2546_v43 = vadd.f32 %v2371_v40, %v2277_v23  ;;  %v1657_v37 = vpop.eup %1656  ;;  %v934_v20 = vadd.f32 %v894_v5, %v2522_v60  ;;  %v2559_v53 = vmul.f32 0.7978846, %v2473_v29 }
 0x1b8   : > { %v2542_v6 = vadd.f32 %v1111_v42, %v1072_v17  ;;  %v2563_v40 = vmul.f32 %v2460_v22, %v2394_v55  ;;  %v2567_v44 = vmul.f32 %v2476_v12, %v2398_v26  ;;  %v755_v30 = vmul.f32 0.5, %v2429_v33 }
 0x1b9   : > { %v1145_v63 = vadd.f32 %v1090_v2, %v1089_v8  ;;  %v839_v2 = vmul.f32 %v799_v46, %v2530_v39  ;;  %v819_v24 = vmul.f32 0.044715, %v2546_v43  ;;  %v775_v46 = vmul.f32 0.5, %v2438_v57 }
 0x1ba   : > { %v974_v45 = vmul.f32 0.7978846, %v934_v20  ;;  %v753_v29 = vmul.f32 0.5, %v2469_v47  ;;  %1668 = vtanh.f32 %v976_v10  ;;  %v797_v22 = vmul.f32 0.044715, %v2550_v1 }
 0x1bb   : > { %v1146_v9 = vadd.f32 %v1145_v63, %v1091_v32  ;;  %v1659_v19 = vpop.eup %1658  ;;  %v859_v41 = vmul.f32 %v819_v24, %v2546_v43  ;;  %v879_v12 = vmul.f32 %v839_v2, %v2530_v39  ;;  %v817_v14 = vmul.f32 0.044715, %v2556_v21 }
 0x1bc   : > { %1670 = vtanh.f32 %v974_v45  ;;  %v2579_v33 = vadd.f32 %v2385_v50, %v2277_v23  ;;  %v773_v57 = vmul.f32 0.5, %v2480_v3  ;;  %v756_v47 = vmul.f32 0.5, %v2498_v16 }
 0x1bd   : > { %v1147_v13 = vadd.f32 %v1146_v9, %v1092_v7  ;;  %v1661_v31 = vpop.eup %1660  ;;  %v2584_v4 = vmul.f32 0.5, %v2504_v25  ;;  %v1033_v54 = vadd.f32 1.0, %v1659_v19  ;;  %v837_v0 = vmul.f32 %v797_v22, %v2550_v1 }
 0x1be   : > { %v1053_v18 = vadd.f32 1.0, %v1661_v31  ;;  %v1663_v27 = vpop.eup %1662  ;;  %v857_v8 = vmul.f32 %v817_v14, %v2556_v21  ;;  %v800_v38 = vmul.f32 0.044715, %v2579_v33  ;;  %v1035_v59 = vadd.f32 1.0, %v1657_v37 }
 0x1bf   : > { %v1665_v11 = vpop.eup %1664  ;;  %v754_v15 = vmul.f32 0.5, %v2508_v35  ;;  %v899_v3 = vmul.f32 %v859_v41, %v2546_v43  ;;  %v919_v16 = vadd.f32 %v879_v12, %v2530_v39  ;;  %v877_v25 = vmul.f32 %v837_v0, %v2550_v1 }
 0x1c0   : > { %v1093_v50 = vmul.f32 %v1053_v18, %v773_v57  ;;  %v1667_v32 = vpop.eup %1666  ;;  %v897_v17 = vmul.f32 %v857_v8, %v2556_v21  ;;  %v840_v42 = vmul.f32 %v800_v38, %v2579_v33  ;;  %v1055_v7 = vadd.f32 1.0, %v1663_v27 }
 0x1c1   : > { %v1034_v5 = vadd.f32 1.0, %v1667_v32  ;;  %v774_v10 = vmul.f32 0.5, %v2522_v60  ;;  %v1073_v37 = vmul.f32 %v1033_v54, %v753_v29  ;;  %v1036_v9 = vadd.f32 1.0, %v1665_v11 }
 0x1c2   : > { %v1148_v63 = vadd.f32 %v1147_v13, %v1093_v50  ;;  %v917_v35 = vadd.f32 %v877_v25, %v2550_v1  ;;  %v937_v20 = vadd.f32 %v897_v17, %v2556_v21  ;;  %v939_v24 = vadd.f32 %v899_v3, %v2546_v43 }
 0x1c3   : > { %v1074_v2 = vmul.f32 %v1034_v5, %v754_v15  ;;  %v880_v45 = vmul.f32 %v840_v42, %v2579_v33  ;;  %v2602_v19 = vadd.f32 %v2387_v51, %v2277_v23  ;;  %v1075_v41 = vmul.f32 %v1035_v59, %v755_v30 }
 0x1c4   : > { %v959_v13 = vmul.f32 0.7978846, %v919_v16  ;;  %v957_v22 = vmul.f32 0.7978846, %v917_v35  ;;  %v2606_v60 = vadd.f32 %v2277_v23, %v2401_v56  ;;  %v1669_v29 = vpop.eup %1668  ;;  %v1095_v31 = vmul.f32 %v1055_v7, %v775_v46 }
 0x1c5   : > { %v1119_v12 = vadd.f32 %v1074_v2, %v1073_v37  ;;  %v977_v14 = vmul.f32 0.7978846, %v937_v20  ;;  %v820_v57 = vmul.f32 0.044715, %v2602_v19  ;;  %v920_v27 = vadd.f32 %v880_v45, %v2579_v33 }
 0x1c6   : > { %v1671_v18 = vpop.eup %1670  ;;  %1672 = vtanh.f32 %v957_v22  ;;  %v798_v51 = vmul.f32 0.044715, %v2606_v60  ;;  %v2613_v30 = vadd.f32 %v2277_v23, %v2403_v58  ;;  %v1076_v54 = vmul.f32 %v1036_v9, %v756_v47 }
 0x1c7   : > { %v1120_v0 = vadd.f32 %v1119_v12, %v1075_v41  ;;  %v1054_v56 = vadd.f32 1.0, %v1671_v18  ;;  %v979_v8 = vmul.f32 0.7978846, %v939_v24  ;;  %v1056_v38 = vadd.f32 1.0, %v1669_v29 }
 0x1c8   : > { %1674 = vtanh.f32 %v959_v13  ;;  %v860_v46 = vmul.f32 %v820_v57, %v2602_v19  ;;  %v838_v11 = vmul.f32 %v798_v51, %v2606_v60  ;;  %v818_v15 = vmul.f32 0.044715, %v2613_v30 }
 0x1c9   : > { %v1094_v59 = vmul.f32 %v1054_v56, %v774_v10  ;;  %v1121_v50 = vadd.f32 %v1120_v0, %v1076_v54  ;;  %1676 = vtanh.f32 %v977_v14  ;;  %v960_v3 = vmul.f32 0.7978846, %v920_v27 }
 0x1ca   : > { %v900_v32 = vmul.f32 %v860_v46, %v2602_v19  ;;  %v878_v58 = vmul.f32 %v838_v11, %v2606_v60  ;;  %v2622_v47 = vadd.f32 %v2424_v28, %v2277_v23  ;;  %1678 = vtanh.f32 %v979_v8 }
 0x1cb   : > { %v1149_v16 = vadd.f32 %v1148_v63, %v1094_v59  ;;  %v858_v25 = vmul.f32 %v818_v15, %v2613_v30  ;;  %v2627_v17 = vadd.f32 %v2431_v34, %v2277_v23  ;;  %v2634_v10 = vadd.f32 %v2277_v23, %v2433_v36 }
 0x1cc   : > { %v940_v42 = vadd.f32 %v900_v32, %v2602_v19  ;;  %v918_v7 = vadd.f32 %v878_v58, %v2606_v60  ;;  %v803_v5 = vmul.f32 0.044715, %v2622_v47  ;;  %v1113_v28 = vrot.slane %v2542_v6, 4 }
 0x1cd   : > { %v1096_v63 = vmul.f32 %v1056_v38, %v2584_v4  ;;  %v1150_v37 = vadd.f32 %v1149_v16, %v1095_v31  ;;  %v898_v9 = vmul.f32 %v858_v25, %v2613_v30  ;;  %v926_v34 = vadd.f32 %v2567_v44, %v2398_v26  ;;  %v2830_v16 = vld [vmem:[#allocation20_spill] sm:$0xff] }
 0x1ce   : > { %1680 = vtanh.f32 %v960_v3  ;;  %v980_v35 = vmul.f32 0.7978846, %v940_v42  ;;  %v958_v20 = vmul.f32 0.7978846, %v918_v7  ;;  %v843_v36 = vmul.f32 %v803_v5, %v2622_v47 }
 0x1cf   : > { %v2641_v2 = vadd.f32 %v1150_v37, %v1096_v63  ;;  %v938_v24 = vadd.f32 %v898_v9, %v2613_v30  ;;  %v823_v45 = vmul.f32 0.044715, %v2627_v17  ;;  %v2648_v4 = vadd.f32 %v2390_v52, %v2317_v61 }
 0x1d0   : > { %v1673_v41 = vpop.eup %1672  ;;  %1682 = vtanh.f32 %v2559_v53  ;;  %v2653_v44 = vmul.f32 %v2563_v40, %v2394_v55  ;;  %v801_v13 = vmul.f32 0.044715, %v2634_v10  ;;  %v2657_v22 = vadd.f32 %v1113_v28, %v2542_v6 }
 0x1d1   : > { %v757_v29 = vmul.f32 0.5, %v2550_v1  ;;  %v1037_v31 = vadd.f32 1.0, %v1673_v41  ;;  %1684 = vtanh.f32 %v958_v20  ;;  %v2660_v14 = vmul.f32 0.7978846, %v926_v34 }
 0x1d2   : > { %v1675_v12 = vpop.eup %1674  ;;  %1686 = vtanh.f32 %v980_v35  ;;  %v978_v52 = vmul.f32 0.7978846, %v938_v24  ;;  %v2664_v53 = vadd.f32 %v2277_v23, %v2440_v48  ;;  %v883_v18 = vmul.f32 %v843_v36, %v2622_v47 }
 0x1d3   : > { %v1677_v40 = vpop.eup %1676  ;;  %v1077_v57 = vmul.f32 %v1037_v31, %v757_v29  ;;  %v863_v6 = vmul.f32 %v823_v45, %v2627_v17  ;;  %v841_v27 = vmul.f32 %v801_v13, %v2634_v10  ;;  %v759_v1 = vmul.f32 0.5, %v2530_v39  ;;  %v2831_v31 = vld [vmem:[#allocation21_spill] sm:$0xff] }
 0x1d4   : > { %v779_v51 = vmul.f32 0.5, %v2546_v43  ;;  %v777_v54 = vmul.f32 0.5, %v2556_v21  ;;  %1688 = vtanh.f32 %v978_v52  ;;  %v1679_v0 = vpop.eup %1678  ;;  %v1115_v56 = vrot.slane %v2657_v22, 2 }
 0x1d5   : > { %v1039_v48 = vadd.f32 1.0, %v1675_v12  ;;  %v1122_v8 = vadd.f32 %v1121_v50, %v1077_v57  ;;  %v881_v38 = vmul.f32 %v841_v27, %v2634_v10  ;;  %v1057_v46 = vadd.f32 1.0, %v1677_v40 }
 0x1d6   : > { %v760_v11 = vmul.f32 0.5, %v2579_v33  ;;  %v821_v59 = vmul.f32 0.044715, %v2664_v53  ;;  %v2678_v39 = vadd.f32 %v2442_v49, %v2277_v23  ;;  %v780_v43 = vmul.f32 0.5, %v2602_v19 }
 0x1d7   : > { %v923_v21 = vadd.f32 %v883_v18, %v2622_v47  ;;  %v903_v15 = vmul.f32 %v863_v6, %v2627_v17  ;;  %v2685_v50 = vadd.f32 %v2446_v62, %v2277_v23  ;;  %v758_v32 = vmul.f32 0.5, %v2606_v60 }
 0x1d8   : > { %v1681_v3 = vpop.eup %1680  ;;  %v861_v33 = vmul.f32 %v821_v59, %v2664_v53  ;;  %v804_v58 = vmul.f32 0.044715, %v2678_v39  ;;  %v2692_v49 = vadd.f32 %v2277_v23, %v2830_v16  ;;  %v1079_v19 = vmul.f32 %v1039_v48, %v759_v1 }
 0x1d9   : > { %v1059_v25 = vadd.f32 1.0, %v1679_v0  ;;  %v778_v42 = vmul.f32 0.5, %v2613_v30  ;;  %v921_v7 = vadd.f32 %v881_v38, %v2634_v10  ;;  %v1097_v62 = vmul.f32 %v1057_v46, %v777_v54 }
 0x1da   : > { %v2696_v5 = vpop.eup %1682  ;;  %v901_v28 = vmul.f32 %v861_v33, %v2664_v53  ;;  %v844_v60 = vmul.f32 %v804_v58, %v2678_v39  ;;  %v824_v63 = vmul.f32 0.044715, %v2685_v50  ;;  %v1040_v9 = vadd.f32 1.0, %v1681_v3 }
 0x1db   : > { %v1685_v37 = vpop.eup %1684  ;;  %v963_v34 = vmul.f32 0.7978846, %v923_v21  ;;  %v943_v35 = vadd.f32 %v903_v15, %v2627_v17  ;;  %v802_v20 = vmul.f32 0.044715, %v2692_v49  ;;  %v961_v13 = vmul.f32 0.7978846, %v921_v7 }
 0x1dc   : > { %v1687_v24 = vpop.eup %1686  ;;  %v1038_v30 = vadd.f32 1.0, %v1685_v37  ;;  %v941_v36 = vadd.f32 %v901_v28, %v2664_v53  ;;  %v884_v45 = vmul.f32 %v844_v60, %v2678_v39  ;;  %v864_v41 = vmul.f32 %v824_v63, %v2685_v50 }
 0x1dd   : > { %v842_v29 = vmul.f32 %v802_v20, %v2692_v49  ;;  %v2709_v12 = vadd.f32 %v2277_v23, %v2831_v31  ;;  %v1955_v27 = vmov 0.0   ;;  %v1060_v1 = vadd.f32 1.0, %v1687_v24 }
 0x1de   : > { %v1689_v52 = vpop.eup %1688  ;;  %v1078_v40 = vmul.f32 %v1038_v30, %v758_v32  ;;  %v981_v57 = vmul.f32 0.7978846, %v941_v36  ;;  %v924_v18 = vadd.f32 %v884_v45, %v2678_v39  ;;  %v904_v6 = vmul.f32 %v864_v41, %v2685_v50  ;;  %319 = vst [vmem:[#allocation2] sm:$0x1f] %v1955_v27 }
 0x1df   : > { %v1058_v54 = vadd.f32 1.0, %v1689_v52  ;;  %v882_v0 = vmul.f32 %v842_v29, %v2692_v49  ;;  %v822_v48 = vmul.f32 0.044715, %v2709_v12  ;;  %v1099_v3 = vmul.f32 %v1059_v25, %v779_v51 }
 0x1e0   : > { %v1123_v38 = vadd.f32 %v1122_v8, %v1078_v40  ;;  %1690 = vtanh.f32 %v981_v57  ;;  %v964_v46 = vmul.f32 0.7978846, %v924_v18  ;;  %v944_v23 = vadd.f32 %v904_v6, %v2685_v50 }
 0x1e1   : > { %v1098_v59 = vmul.f32 %v1058_v54, %v778_v42  ;;  %1692 = vtanh.f32 %v961_v13  ;;  %v922_v21 = vadd.f32 %v882_v0, %v2692_v49  ;;  %v862_v15 = vmul.f32 %v822_v48, %v2709_v12 }
 0x1e2   : > { %v1080_v32 = vmul.f32 %v1040_v9, %v760_v11  ;;  %v1124_v33 = vadd.f32 %v1123_v38, %v1079_v19  ;;  %1694 = vtanh.f32 %v963_v34  ;;  %v983_v16 = vmul.f32 0.7978846, %v943_v35 }
 0x1e3   : > { %v1158_v58 = vadd.f32 %v1098_v59, %v1097_v62  ;;  %v962_v7 = vmul.f32 0.7978846, %v922_v21  ;;  %v902_v28 = vmul.f32 %v862_v15, %v2709_v12  ;;  %v928_v8 = vadd.f32 %v2653_v44, %v2394_v55 }
 0x1e4   : > { %v1125_v60 = vadd.f32 %v1124_v33, %v1080_v32  ;;  %1696 = vtanh.f32 %v964_v46  ;;  %v984_v42 = vmul.f32 0.7978846, %v944_v23  ;;  %v1100_v63 = vmul.f32 %v1060_v1, %v780_v43 }
 0x1e5   : > { %v1159_v37 = vadd.f32 %v1158_v58, %v1099_v3  ;;  %1698 = vtanh.f32 %v962_v7  ;;  %v942_v20 = vadd.f32 %v902_v28, %v2709_v12  ;;  %v967_v51 = vmul.f32 0.7978846, %v2648_v4  ;;  %v2832_v58 = vld [vmem:[#allocation19_spill] sm:$0xff] }
 0x1e6   : > { %1700 = vtanh.f32 %v2660_v14  ;;  %v1126_v11 = vrot.slane %v1125_v60, 4  ;;  %v1116_v19 = vadd.f32 %v1115_v56, %v2657_v22  ;;  %v968_v62 = vmul.f32 0.7978846, %v928_v8 }
 0x1e7   : > { %1702 = vtanh.f32 %v983_v16  ;;  %v1160_v25 = vadd.f32 %v1159_v37, %v1100_v63  ;;  %v982_v44 = vmul.f32 0.7978846, %v942_v20  ;;  %v781_v4 = vmul.f32 0.5, %v2664_v53 }
 0x1e8   : > { %v1127_v9 = vadd.f32 %v1126_v11, %v1125_v60  ;;  %1704 = vtanh.f32 %v984_v42  ;;  %v1117_v24 = vrot.slane %v1116_v19, 1  ;;  %v761_v31 = vmul.f32 0.5, %v2634_v10 }
 0x1e9   : > { %1706 = vtanh.f32 %v982_v44  ;;  %v762_v6 = vmul.f32 0.5, %v2692_v49  ;;  %v763_v1 = vmul.f32 0.5, %v2622_v47  ;;  %v1045_v59 = vadd.f32 1.0, %v2696_v5 }
 0x1ea   : > { %v1691_v43 = vpop.eup %1690  ;;  %1708 = vtanh.f32 %v967_v51  ;;  %v1128_v34 = vrot.slane %v1127_v9, 2  ;;  %v1118_v29 = vadd.f32 %v1117_v24, %v1116_v19  ;;  %v764_v10 = vmul.f32 0.5, %v2678_v39 }
 0x1eb   : > { %v1693_v35 = vpop.eup %1692  ;;  %v1061_v14 = vadd.f32 1.0, %v1691_v43  ;;  %1710 = vtanh.f32 %v968_v62  ;;  %v782_v21 = vmul.f32 0.5, %v2709_v12  ;;  %v765_v47 = vmul.f32 0.5, %v2832_v58  ;;  %v1417_v58 = vld [vmem:[#allocation9] ss:$0 sm:$0xff] }
 0x1ec   : > { %v1695_v30 = vpop.eup %1694  ;;  %v1129_v36 = vadd.f32 %v1128_v34, %v1127_v9  ;;  %v1041_v41 = vadd.f32 1.0, %v1693_v35  ;;  %v783_v7 = vmul.f32 0.5, %v2627_v17  ;;  %v766_v39 = vmul.f32 0.5, %v2398_v26 }
 0x1ed   : > { %v1101_v45 = vmul.f32 %v1061_v14, %v781_v4  ;;  %v1043_v18 = vadd.f32 1.0, %v1695_v30  ;;  %v1085_v37 = vmul.f32 %v1045_v59, %v765_v47  ;;  %v784_v20 = vmul.f32 0.5, %v2685_v50 }
 0x1ee   : > { %v1697_v22 = vpop.eup %1696  ;;  %v1130_v56 = vrot.slane %v1129_v36, 1  ;;  %v1081_v48 = vmul.f32 %v1041_v41, %v761_v31  ;;  %v767_v19 = vmul.f32 0.5, %v2317_v61  ;;  %v1152_v44 = vrot.slane %v2641_v2, 4 }
 0x1ef   : > { %v1699_v13 = vpop.eup %1698  ;;  %v1161_v52 = vadd.f32 %v1160_v25, %v1101_v45  ;;  %v1044_v38 = vadd.f32 1.0, %v1697_v22  ;;  %v1083_v3 = vmul.f32 %v1043_v18, %v763_v1  ;;  %v768_v35 = vmul.f32 0.5, %v2394_v55 }
 0x1f0   : > { %v1701_v40 = vpop.eup %1700  ;;  %v1131_v57 = vadd.f32 %v1130_v56, %v1129_v36  ;;  %v1042_v53 = vadd.f32 1.0, %v1699_v13  ;;  %v1153_v26 = vadd.f32 %v1152_v44, %v2641_v2 }
 0x1f1   : > { %v1703_v27 = vpop.eup %1702  ;;  %v1046_v16 = vadd.f32 1.0, %v1701_v40  ;;  %v1084_v8 = vmul.f32 %v1044_v38, %v764_v10 }
 0x1f2   : > { %v1705_v54 = vpop.eup %1704  ;;  %v2731_v0 = vsel %vm1176_vm1, %v1131_v57, %v1118_v29  ;;  %v1082_v46 = vmul.f32 %v1042_v53, %v762_v6  ;;  %v1063_v49 = vadd.f32 1.0, %v1703_v27  ;;  %v1154_v61 = vrot.slane %v1153_v26, 2  ;;  %v1105_v6 = vld [vmem:[#allocation2] sm:$0x1f] }
 0x1f3   : > { %v1707_v23 = vpop.eup %1706  ;;  %v1064_v60 = vadd.f32 1.0, %v1705_v54  ;;  %v1086_v17 = vmul.f32 %v1046_v16, %v766_v39  ;;  %v1418_v16 = vld [vmem:[#allocation11] ss:$0 sm:$0xff] }
 0x1f4   : > { %v1709_v15 = vpop.eup %1708  ;;  %v1132_v32 = vadd.f32 %v1082_v46, %v1081_v48  ;;  %v1062_v33 = vadd.f32 1.0, %v1707_v23  ;;  %v1103_v12 = vmul.f32 %v1063_v49, %v783_v7  ;;  %v1155_v13 = vadd.f32 %v1154_v61, %v1153_v26 }
 0x1f5   : > { %v1711_v28 = vpop.eup %1710  ;;  %v1047_v5 = vadd.f32 1.0, %v1709_v15  ;;  %v1104_v62 = vmul.f32 %v1064_v60, %v784_v20 }
 0x1f6   : > { %v1133_v42 = vadd.f32 %v1132_v32, %v1083_v3  ;;  %v1102_v63 = vmul.f32 %v1062_v33, %v782_v21  ;;  %v1048_v25 = vadd.f32 1.0, %v1711_v28  ;;  %v1156_v40 = vrot.slane %v1155_v13, 1 }
 0x1f7   : > { %v1087_v34 = vmul.f32 %v1047_v5, %v767_v19 }
 0x1f8   : > { %v1134_v51 = vadd.f32 %v1133_v42, %v1084_v8  ;;  %v1162_v11 = vadd.f32 %v1161_v52, %v1102_v63  ;;  %v1088_v14 = vmul.f32 %v1048_v25, %v768_v35  ;;  %v1157_v2 = vadd.f32 %v1156_v40, %v1155_v13 }
 0x1fa   : > { %v1135_v9 = vadd.f32 %v1134_v51, %v1085_v37  ;;  %v1163_v43 = vadd.f32 %v1162_v11, %v1103_v12 }
 0x1fc   : > { %v1136_v24 = vadd.f32 %v1135_v9, %v1086_v17  ;;  %v1164_v4 = vadd.f32 %v1163_v43, %v1104_v62 }
 0x1fe   : > { %v1137_v50 = vadd.f32 %v1136_v24, %v1087_v34  ;;  %v1165_v30 = vrot.slane %v1164_v4, 4 }
 0x200   : > { %v1138_v36 = vadd.f32 %v1137_v50, %v1088_v14  ;;  %v1166_v45 = vadd.f32 %v1165_v30, %v1164_v4 }
 0x202   : > { %v1139_v22 = vrot.slane %v1138_v36, 4  ;;  %v1167_v56 = vrot.slane %v1166_v45, 2 }
 0x204   : > { %v1140_v41 = vadd.f32 %v1139_v22, %v1138_v36  ;;  %v1168_v31 = vadd.f32 %v1167_v56, %v1166_v45 }
 0x206   : > { %v1141_v29 = vrot.slane %v1140_v41, 2  ;;  %v1169_v55 = vrot.slane %v1168_v31, 1 }
 0x208   : > { %v1142_v52 = vadd.f32 %v1141_v29, %v1140_v41  ;;  %v1170_v53 = vadd.f32 %v1169_v55, %v1168_v31 }
 0x20a   : > { %v1143_v57 = vrot.slane %v1142_v52, 1 }
 0x20c   : > { %v1144_v18 = vadd.f32 %v1143_v57, %v1142_v52 }
 0x20e   : > { %v1179_v27 = vsel %vm1178_vm2, %v1144_v18, %v2731_v0 }
 0x20f   : > { %v1181_v1 = vsel %vm1180_vm3, %v1157_v2, %v1179_v27 }
 0x210   : > { %v1183_v54 = vsel %vm1182_vm4, %v1170_v53, %v1181_v1 }
 0x211   : > { %v1185_v48 = vadd.f32 %v1183_v54, %v1105_v6 }
 0x213   : > { %1186 = vst [vmem:[#allocation2] sm:$0x1f] %v1185_v48 }
 0x21a   : > { %v1190_v38 = vld [vmem:[#allocation2] sm:$0x1f] }
 0x21b   : > { %v1191_v46 = vmul.f32 0.015625, %v1190_v38 }
 0x21d   : > { %v1193_v23 = vsel %vm1192_vm5, %v1191_v46, 0.0 }
 0x21e   : > { %1194 = vadd.xlane.f32.xlu0 %v1193_v23 }
 0x2ab   : > { %v1195_v59 = vpop.xlane.xlu0 %1194 }
 0x2ac   : > { %v1197_v10 = vmul.f32 0.0078125, %v1195_v59 }
 0x2ae   : > { %v1198_v21 = vsub.f32 %v1191_v46, %v1197_v10 }
 0x2b0   : > { %v1199_v15 = vmul.f32 %v1198_v21, %v1198_v21 }
 0x2b2   : > { %v1200_v3 = vsel %vm1192_vm5, %v1199_v15, 0.0 }
 0x2b3   : > { %1201 = vadd.xlane.f32.xlu0 %v1200_v3 }
 0x340   : > { %v1202_v49 = vpop.xlane.xlu0 %1201 }
 0x341   : > { %v1203_v32 = vmul.f32 0.0078125, %v1202_v49 }
 0x343   : > { %v1204_v0 = vadd.f32 1e-06, %v1203_v32 }
 0x345   : > { %1712 = vrsqrt.f32 %v1204_v0 }
 0x34f   : > { %v1713_v33 = vpop.eup %1712 }
 0x350   : > { %v1206_v47 = vmul.f32 %v1713_v33, %v1198_v21 }
 0x352   : > { %v1214_v7 = vmul.f32 %v1417_v58, %v1206_v47 }
 0x354   : > { %v1222_v28 = vadd.f32 %v1418_v16, %v1214_v7 }
 0x356   : > { %1223 = vst [vmem:[%s311_s30] sm:$0x1f] %v1222_v28 }
 0x357   : > { %1869 = shalt.err (!%p1866_p0)
}
 0x358   : > { %s1870_s17 = scalar_lea.hbm %s2750_s12, 128  ;;  %s1874_s14 = scalar_lea.hbm %s2804_s5, 256 }
 0x359   : > { %p1871_p4 = scmp.ne.s32.totalorder %s2750_s12, %s1870_s17  ;;  %p1875_p12 = scmp.lt.u32.totalorder %s2750_s12, %s2804_s5 }
 0x35a   : > { %p1876_p1 = scmp.lt.u32.totalorder %s1874_s14, %s1870_s17  ;;  %p1878_p2 = scmp.lt.u32.totalorder %s1870_s17, %s2750_s12 }
 0x35b   : > { %p1872_p13 = pnand %p1871_p4, %p2163_p5 }
 0x35c   : > { %p1877_p11 = por %p1876_p1, %p1875_p12 }
 0x35d   : > { %p1873_p6 = pneg %p1872_p13 }
 0x35e   : > { %p1879_p8 = por %p1878_p2, %p1877_p11 }
 0x360   : > { %p1880_p10 = pnand %p1879_p8, %p1873_p6 }
 0x362   : > { %1883 = shalt.err (!%p1880_p10)
}
 0x363   : > { %1521 = dma.vmem_to_hbm [thread:$0]  (%p2163_p5), %s2752_s11, 128, %s2750_s12, %s1225_s29  }
 0x364 PF: > { %s2833_s26 = sld [smem:[#allocation17_spill]]  ;;  %s2834_s28 = sld [smem:[#allocation18_spill]] }
 0x365   : > { %p2836_p7 = scmp.ge.s32.totalorder %s1946_s23, 2 }
 0x36a   : > { %s1250_s30 = sand.u32 1, %s2833_s26   ;;  %p2835_p3 = scmp.ne.s32.totalorder %s2834_s28, 0 }
 0x36b   : > { %s1251_s13 = scalar_lea.sflag [#allocation5], %s1250_s30 }
 0x36c   : > { %p1541_p9 = pnand %p2836_p7, %p2835_p3 }
 0x36e   : > { %1921 = dma.done.wait (!%p1541_p9), %s1251_s13, 128  }
 0x36f   : > { %1923 = vsyncadd (!%p1541_p9), %s1251_s13, 4294967168  ;;  %s23_s23 = sadd.s32 1, %s1946_s23   ;;  %s2837_s18 = smov %s1930_s19 }
 0x370   : > { %p20_p0 = scmp.ge.s32.totalorder %s23_s23, 4   ;;  %s2838_s19 = smov %s1934_s20 }
 0x371   : > { %s2839_s20 = smov %s2175_s7  ;;  %s2840_s21 = smov %s1942_s22 }
 0x372   : > { %s2841_s22 = smov %s2843_s24  ;;  %22 = sbr.rel (!%p20_p0) target bundleno = 8 (0x8), region = 109 }
 0x379   :  { %1256 = vsyncpa [#allocation4], 1 }
 0x37a   :  { %1258 = vsyncpa [#allocation4 + $0x1], 1 }
 0x37b   :  { %1259 = vsyncpa [#allocation7], 1 }
 0x37c   :  { %1260 = vsyncpa [#allocation10], 1 }
 0x37d   :  { %1261 = vsyncpa [#allocation5], 1 }
 0x37e   :  { %1263 = vsyncpa [#allocation5 + $0x1], 1 }

</bundles_post_ra>
